<compile_context>
chip_gen: v7x
topology: tpu7x:2x2x1
jax: 0.10.0
libtpu: 0.0.40
codegen_flags: <defaults>
</compile_context>

<pallas_src>
import math
import functools

import jax
import jax.numpy as jnp
from jax import lax
from jax.experimental import pallas as pl
from jax.experimental.pallas import tpu as pltpu


# ----------------------------------------------------------------------------
# In-kernel helpers (only ops with guaranteed Mosaic lowerings: exp, div, mul)
# ----------------------------------------------------------------------------
def _erf(x):
    # Abramowitz & Stegun 7.1.26, |err| <= 1.5e-7 — avoids relying on a
    # native erf lowering while keeping "exact" (erf-based) GELU semantics.
    a1, a2, a3, a4, a5 = (0.254829592, -0.284496736, 1.421413741,
                          -1.453152027, 1.061405429)
    p = 0.3275911
    sgn = jnp.where(x >= 0.0, 1.0, -1.0)
    ax = jnp.abs(x)
    t = 1.0 / (1.0 + p * ax)
    poly = ((((a5 * t + a4) * t + a3) * t + a2) * t + a1) * t
    return sgn * (1.0 - poly * jnp.exp(-ax * ax))


def _gelu_exact(x):
    return 0.5 * x * (1.0 + _erf(x * (1.0 / math.sqrt(2.0))))


# ----------------------------------------------------------------------------
# Pallas kernel
# ----------------------------------------------------------------------------
def make_rnn_kernel(num_layers: int):
    L = num_layers

    def kernel(*refs):
        idx = 0
        x_ref = refs[idx]; idx += 1              # (T, Bp, D)   mm_dtype, time-major
        h0_ref = refs[idx]; idx += 1             # (L, Bp, H)   f32
        c0_ref = refs[idx]; idx += 1             # (L, Bp, H)   f32
        wih_refs = refs[idx:idx + L]; idx += L   # layer l: (D_l, 4H) mm_dtype
        whh_refs = refs[idx:idx + L]; idx += L   # layer l: (H, 4H)   mm_dtype
        b_refs = refs[idx:idx + L]; idx += L     # layer l: (1, 4H)   f32 (b_ih+b_hh)
        fcw_ref = refs[idx]; idx += 1            # (H, AH)  mm_dtype
        fcb_ref = refs[idx]; idx += 1            # (1, AH)  f32
        ahw_ref = refs[idx]; idx += 1            # (AH, A)  mm_dtype
        ahb_ref = refs[idx]; idx += 1            # (1, A)   f32
        act_ref = refs[idx]; idx += 1            # (T*Bp, A)  f32   (lane-dense slab)
        hn_ref = refs[idx]; idx += 1             # (L, Bp, H) f32
        cn_ref = refs[idx]; idx += 1             # (L, Bp, H) f32
        xproj_ref = refs[idx]; idx += 1          # scratch (T, Bp, 4H) f32
        io_ref = refs[idx]; idx += 1             # scratch (T, Bp, H)  mm_dtype

        T, Bp, D = x_ref.shape
        H = hn_ref.shape[2]
        mm_dtype = x_ref.dtype

        # Partial unroll so the LLO scheduler sees the serial stream; full
        # unroll only for short sequences (bounds vreg pressure).
        unroll = T if T <= 16 else 8

        for l in range(L):
            # ---- batched input projection + fused bias: ONE big MXU matmul
            if l == 0:
                inp_flat = x_ref[...].reshape(T * Bp, D)
            else:
                inp_flat = io_ref[...].reshape(T * Bp, H)
            xproj = jnp.dot(inp_flat, wih_refs[l][...],
                            preferred_element_type=jnp.float32) + b_refs[l][...]
            xproj_ref[...] = xproj.reshape(T, Bp, 4 * H)

            whh = whh_refs[l][...]               # (H, 4H), loop-invariant load

            # ---- serial recurrence: only h @ W_hh + gate math per step.
            def step(t, carry, whh=whh):
                h, c = carry                     # (Bp, H) f32
                gates = xproj_ref[t] + jnp.dot(h.astype(mm_dtype), whh,
                                               preferred_element_type=jnp.float32)
                # gate column order (wrapper reorder): i, f, o | g
                sig = jax.nn.sigmoid(gates[:, 0:3 * H])
                i_g = sig[:, 0 * H:1 * H]
                f_g = sig[:, 1 * H:2 * H]
                o_g = sig[:, 2 * H:3 * H]
                g_g = jnp.tanh(gates[:, 3 * H:4 * H])
                c_new = f_g * c + i_g * g_g
                h_new = o_g * jnp.tanh(c_new)
                io_ref[t] = h_new.astype(mm_dtype)
                return h_new, c_new

            h_fin, c_fin = lax.fori_loop(0, T, step, (h0_ref[l], c0_ref[l]),
                                         unroll=unroll)
            hn_ref[l] = h_fin
            cn_ref[l] = c_fin

        # ---- head, batched over all T*Bp rows (only the LSTM was serial).
        rnn_out = io_ref[...].reshape(T * Bp, H)               # already mm_dtype
        hid = jnp.dot(rnn_out, fcw_ref[...],
                      preferred_element_type=jnp.float32) + fcb_ref[...]
        hid = _gelu_exact(hid)
        # Dropout(p=0.1): eval-mode identity.
        act = jnp.dot(hid.astype(mm_dtype), ahw_ref[...],
                      preferred_element_type=jnp.float32) + ahb_ref[...]
        act_ref[...] = act.astype(act_ref.dtype)

    return kernel


# ----------------------------------------------------------------------------
# Wrapper
# ----------------------------------------------------------------------------
@functools.partial(jax.jit, static_argnames=("return_hidden", "matmul_dtype"))
def rnn_forward(all_state, params, h0, c0, return_hidden=False,
                matmul_dtype=jnp.bfloat16):
    """all_state: (B, T, D) batch_first, like the PyTorch module."""
    B, T, D = all_state.shape
    L, _, H = h0.shape                     # static: derived from shapes
    AH = params["fc_w"].shape[0]
    A = params["ah_w"].shape[0]

    Bp = max(8, ((B + 7) // 8) * 8)        # pad batch to f32 sublane height
    pad = Bp - B

    # Sequence input in matmul dtype (only ever an MXU operand).
    x_tm = jnp.transpose(all_state, (1, 0, 2)).astype(matmul_dtype)   # (T, B, D)
    x_tm = jnp.pad(x_tm, ((0, 0), (0, pad), (0, 0)))
    h0p = jnp.pad(h0.astype(jnp.float32), ((0, 0), (0, pad), (0, 0)))
    c0p = jnp.pad(c0.astype(jnp.float32), ((0, 0), (0, pad), (0, 0)))

    # Reorder gate blocks (PyTorch order i,f,g,o) -> [i, f, o | g] so the
    # three sigmoid gates are a single contiguous lane region in the kernel.
    def reorder(w):                        # w: (4H, ...) or (4H,)
        i, f, g, o = jnp.split(w, 4, axis=0)
        return jnp.concatenate([i, f, o, g], axis=0)

    wih, whh, biases = [], [], []
    for l in range(L):
        wih.append(jnp.transpose(reorder(params[f"w_ih_l{l}"]))
                   .astype(matmul_dtype))                             # (D_l, 4H)
        whh.append(jnp.transpose(reorder(params[f"w_hh_l{l}"]))
                   .astype(matmul_dtype))                             # (H, 4H)
        biases.append(reorder(params[f"b_ih_l{l}"] + params[f"b_hh_l{l}"])
                      .reshape(1, 4 * H).astype(jnp.float32))
    fc_w = jnp.transpose(params["fc_w"]).astype(matmul_dtype)         # (H, AH)
    fc_b = params["fc_b"].reshape(1, AH).astype(jnp.float32)
    ah_w = jnp.transpose(params["ah_w"]).astype(matmul_dtype)         # (AH, A)
    ah_b = params["ah_b"].reshape(1, A).astype(jnp.float32)

    kernel = make_rnn_kernel(L)
    acts_flat, h_n, c_n = pl.pallas_call(
        kernel,
        out_shape=[
            jax.ShapeDtypeStruct((T * Bp, A), jnp.float32),
            jax.ShapeDtypeStruct((L, Bp, H), jnp.float32),
            jax.ShapeDtypeStruct((L, Bp, H), jnp.float32),
        ],
        scratch_shapes=[
            pltpu.VMEM((T, Bp, 4 * H), jnp.float32),   # per-layer input projection
            pltpu.VMEM((T, Bp, H), matmul_dtype),      # layer IO / rnn output
        ],
    )(x_tm, h0p, c0p, *wih, *whh, *biases, fc_w, fc_b, ah_w, ah_b)

    acts_tm = acts_flat.reshape(T, Bp, A)
    actions = jnp.transpose(acts_tm[:, :B, :], (1, 0, 2))             # (B, T, A)
    if return_hidden:
        return actions, (h_n[:, :B, :], c_n[:, :B, :])
    return actions


# ----------------------------------------------------------------------------
# Pure-JAX reference (gold standard, HIGHEST-precision f32 matmuls)
# ----------------------------------------------------------------------------
def rnn_reference(all_state, params, h0, c0):
    L, _, H = h0.shape
    hp = lax.Precision.HIGHEST
    layer_in = jnp.transpose(all_state.astype(jnp.float32), (1, 0, 2))
    h_fin, c_fin = [], []
    for l in range(L):
        w_ih = params[f"w_ih_l{l}"]
        w_hh = params[f"w_hh_l{l}"]
        b = params[f"b_ih_l{l}"] + params[f"b_hh_l{l}"]

        def step(carry, x_t, w_ih=w_ih, w_hh=w_hh, b=b):
            h, c = carry
            g = (jnp.dot(x_t, w_ih.T, precision=hp)
                 + jnp.dot(h, w_hh.T, precision=hp) + b)
            i = jax.nn.sigmoid(g[:, 0 * H:1 * H])
            f = jax.nn.sigmoid(g[:, 1 * H:2 * H])
            gg = jnp.tanh(g[:, 2 * H:3 * H])
            o = jax.nn.sigmoid(g[:, 3 * H:4 * H])
            c_new = f * c + i * gg
            h_new = o * jnp.tanh(c_new)
            return (h_new, c_new), h_new

        (h_l, c_l), outs = lax.scan(step, (h0[l], c0[l]), layer_in)
        layer_in = outs
        h_fin.append(h_l)
        c_fin.append(c_l)
    rnn_out = jnp.transpose(layer_in, (1, 0, 2))                      # (B, T, H)
    hid = jax.nn.gelu(jnp.dot(rnn_out, params["fc_w"].T, precision=hp)
                      + params["fc_b"], approximate=False)
    acts = jnp.dot(hid, params["ah_w"].T, precision=hp) + params["ah_b"]
    return acts, (jnp.stack(h_fin), jnp.stack(c_fin))


# ----------------------------------------------------------------------------
# Deterministic parameter init (shapes mirror the PyTorch module's __init__).
# ----------------------------------------------------------------------------
def init_params(key, input_dim, hidden_dim, num_layers, actor_hidden_dim,
                action_dim):
    params = {}
    k = 1.0 / math.sqrt(hidden_dim)
    for l in range(num_layers):
        d_in = input_dim if l == 0 else hidden_dim
        key, k1, k2, k3, k4 = jax.random.split(key, 5)
        params[f"w_ih_l{l}"] = jax.random.uniform(
            k1, (4 * hidden_dim, d_in), jnp.float32, -k, k)
        params[f"w_hh_l{l}"] = jax.random.uniform(
            k2, (4 * hidden_dim, hidden_dim), jnp.float32, -k, k)
        params[f"b_ih_l{l}"] = jax.random.uniform(
            k3, (4 * hidden_dim,), jnp.float32, -k, k)
        params[f"b_hh_l{l}"] = jax.random.uniform(
            k4, (4 * hidden_dim,), jnp.float32, -k, k)
    key, k1, k2, k3, k4 = jax.random.split(key, 5)
    kf = 1.0 / math.sqrt(hidden_dim)
    params["fc_w"] = jax.random.uniform(
        k1, (actor_hidden_dim, hidden_dim), jnp.float32, -kf, kf)
    params["fc_b"] = jax.random.uniform(
        k2, (actor_hidden_dim,), jnp.float32, -kf, kf)
    ka = 1.0 / math.sqrt(actor_hidden_dim)
    params["ah_w"] = jax.random.uniform(
        k3, (action_dim, actor_hidden_dim), jnp.float32, -ka, ka)
    params["ah_b"] = jax.random.uniform(
        k4, (action_dim,), jnp.float32, -ka, ka)
    return params


if __name__ == "__main__":
    # policy_config analogue:
    #   camera_num=2, len(objects_names)=1 -> visual_embedding_dim = 1*4*2 = 8
    #   state_dim=8, num_next_action=1     -> state_total_dim = 8 + 8 + 8 = 24
    #   rnn_layers=2, rnn_hidden_dim=32, actor_hidden_dim=32, action_dim=16
    B, T = 2, 8
    input_dim = 24
    hidden_dim = 32
    num_layers = 2
    actor_hidden_dim = 32
    action_dim = 16

    key = jax.random.PRNGKey(0)
    key, kp, kx = jax.random.split(key, 3)
    params = init_params(kp, input_dim, hidden_dim, num_layers,
                         actor_hidden_dim, action_dim)
    all_state = jax.random.normal(kx, (B, T, input_dim), jnp.float32)

    h0 = jnp.zeros((num_layers, B, hidden_dim), jnp.float32)
    c0 = jnp.zeros((num_layers, B, hidden_dim), jnp.float32)

    ref_act, (ref_h, ref_c) = rnn_reference(all_state, params, h0, c0)

    # hidden=None path (actions only), f32 matmul operands.
    # Tolerance allows for MXU multi-pass handling of f32 operands.
    actions_f32 = rnn_forward(all_state, params, h0, c0,
                              return_hidden=False, matmul_dtype=jnp.float32)
    actions_f32 = jax.block_until_ready(actions_f32)
    assert actions_f32.shape == (B, T, action_dim)
    assert jnp.allclose(actions_f32, ref_act, rtol=2e-2, atol=2e-2)

    # hidden provided path, default bf16 matmul operands (MXU-native on all
    # generations); gate math / (h, c) state stay f32, so the error budget is
    # small.
    actions_bf, (h_n, c_n) = rnn_forward(all_state, params, h0, c0,
                                         return_hidden=True)
    jax.block_until_ready((actions_bf, h_n, c_n))
    assert actions_bf.shape == (B, T, action_dim)
    assert h_n.shape == (num_layers, B, hidden_dim)
    assert c_n.shape == (num_layers, B, hidden_dim)
    assert jnp.allclose(actions_bf, ref_act, rtol=5e-2, atol=5e-2)
    assert jnp.allclose(h_n, ref_h, rtol=5e-2, atol=5e-2)
    assert jnp.allclose(c_n, ref_c, rtol=5e-2, atol=5e-2)

    print("KERNEL_OK")
</pallas_src>

<mosaic_0001>
module attributes {stable_mosaic.version = 11 : i64} {
  func.func @kernel(%arg0: memref<8x8x24xf32, #tpu.memory_space<vmem>>, %arg1: memref<2x8x32xf32, #tpu.memory_space<vmem>>, %arg2: memref<2x8x32xf32, #tpu.memory_space<vmem>>, %arg3: memref<24x128xf32, #tpu.memory_space<vmem>>, %arg4: memref<32x128xf32, #tpu.memory_space<vmem>>, %arg5: memref<32x128xf32, #tpu.memory_space<vmem>>, %arg6: memref<32x128xf32, #tpu.memory_space<vmem>>, %arg7: memref<1x128xf32, #tpu.memory_space<vmem>>, %arg8: memref<1x128xf32, #tpu.memory_space<vmem>>, %arg9: memref<32x32xf32, #tpu.memory_space<vmem>>, %arg10: memref<1x32xf32, #tpu.memory_space<vmem>>, %arg11: memref<32x16xf32, #tpu.memory_space<vmem>>, %arg12: memref<1x16xf32, #tpu.memory_space<vmem>>, %arg13: memref<64x16xf32, #tpu.memory_space<vmem>>, %arg14: memref<2x8x32xf32, #tpu.memory_space<vmem>>, %arg15: memref<2x8x32xf32, #tpu.memory_space<vmem>>, %arg16: memref<8x8x128xf32, #tpu.memory_space<vmem>>, %arg17: memref<8x8x32xf32, #tpu.memory_space<vmem>>) attributes {dimension_semantics = [], scalar_prefetch = 0 : i64, scratch_operands = 2 : i64, tpu.core_type = #tpu.core_type<tc>} {
    %c0 = arith.constant 0 : index
    %c0_0 = arith.constant 0 : index
    %c0_1 = arith.constant 0 : index
    %0 = vector.load %arg0[%c0, %c0_0, %c0_1] : memref<8x8x24xf32, #tpu.memory_space<vmem>>, vector<8x8x24xf32>
    %1 = vector.shape_cast %0 : vector<8x8x24xf32> to vector<64x24xf32>
    %c0_2 = arith.constant 0 : index
    %c0_3 = arith.constant 0 : index
    %2 = vector.load %arg3[%c0_2, %c0_3] : memref<24x128xf32, #tpu.memory_space<vmem>>, vector<24x128xf32>
    %cst = arith.constant dense<0.000000e+00> : vector<64x128xf32>
    %3 = tpu.matmul %1, %2, %cst {dimension_numbers = #tpu.dot_dimension_numbers<[1], [0], [0], [1], [0, 0, 1, 1], [], []>} : vector<64x24xf32>, vector<24x128xf32>, vector<64x128xf32> -> vector<64x128xf32>
    %c0_4 = arith.constant 0 : index
    %c0_5 = arith.constant 0 : index
    %4 = vector.load %arg7[%c0_4, %c0_5] : memref<1x128xf32, #tpu.memory_space<vmem>>, vector<1x128xf32>
    %5 = vector.broadcast %4 : vector<1x128xf32> to vector<64x128xf32>
    %6 = arith.addf %3, %5 : vector<64x128xf32>
    %7 = vector.shape_cast %6 : vector<64x128xf32> to vector<8x8x128xf32>
    %c0_6 = arith.constant 0 : index
    %c0_7 = arith.constant 0 : index
    %c0_8 = arith.constant 0 : index
    %8 = vector.load %arg16[%c0_6, %c0_7, %c0_8] : memref<8x8x128xf32, #tpu.memory_space<vmem>>, vector<8x8x128xf32>
    tpu.vector_store %arg16[%c0_6, %c0_7, %c0_8], %7 {strides = array<i32>} : memref<8x8x128xf32, #tpu.memory_space<vmem>>, vector<8x8x128xf32>,
    %c0_9 = arith.constant 0 : index
    %c0_10 = arith.constant 0 : index
    %9 = vector.load %arg5[%c0_9, %c0_10] : memref<32x128xf32, #tpu.memory_space<vmem>>, vector<32x128xf32>
    %c0_11 = arith.constant 0 : index
    %c0_12 = arith.constant 0 : index
    %c0_13 = arith.constant 0 : index
    %10 = vector.load %arg1[%c0_11, %c0_12, %c0_13] : memref<2x8x32xf32, #tpu.memory_space<vmem>>, vector<1x8x32xf32>
    %11 = vector.shape_cast %10 : vector<1x8x32xf32> to vector<8x32xf32>
    %c0_14 = arith.constant 0 : index
    %c0_15 = arith.constant 0 : index
    %c0_16 = arith.constant 0 : index
    %12 = vector.load %arg2[%c0_14, %c0_15, %c0_16] : memref<2x8x32xf32, #tpu.memory_space<vmem>>, vector<1x8x32xf32>
    %13 = vector.shape_cast %12 : vector<1x8x32xf32> to vector<8x32xf32>
    %c0_i32 = arith.constant 0 : i32
    %14 = arith.index_cast %c0_i32 : i32 to index
    %c0_17 = arith.constant 0 : index
    %c0_18 = arith.constant 0 : index
    %15 = vector.load %arg16[%14, %c0_17, %c0_18] : memref<8x8x128xf32, #tpu.memory_space<vmem>>, vector<1x8x128xf32>
    %16 = vector.shape_cast %15 : vector<1x8x128xf32> to vector<8x128xf32>
    %cst_19 = arith.constant dense<0.000000e+00> : vector<8x128xf32>
    %17 = tpu.matmul %11, %9, %cst_19 {dimension_numbers = #tpu.dot_dimension_numbers<[1], [0], [0], [1], [0, 0, 1, 1], [], []>} : vector<8x32xf32>, vector<32x128xf32>, vector<8x128xf32> -> vector<8x128xf32>
    %18 = arith.addf %16, %17 : vector<8x128xf32>
    %19 = vector.extract_strided_slice %18 {offsets = [0, 0], sizes = [8, 96], strides = [1, 1]} : vector<8x128xf32> to vector<8x96xf32>
    %20 = arith.negf %19 : vector<8x96xf32>
    %21 = math.exp %20 : vector<8x96xf32>
    %cst_20 = arith.constant 1.000000e+00 : f32
    %22 = vector.broadcast %cst_20 : f32 to vector<8x96xf32>
    %23 = arith.addf %22, %21 : vector<8x96xf32>
    %24 = arith.divf %22, %23 : vector<8x96xf32>
    %25 = vector.extract_strided_slice %24 {offsets = [0, 0], sizes = [8, 32], strides = [1, 1]} : vector<8x96xf32> to vector<8x32xf32>
    %26 = vector.extract_strided_slice %24 {offsets = [0, 32], sizes = [8, 32], strides = [1, 1]} : vector<8x96xf32> to vector<8x32xf32>
    %27 = vector.extract_strided_slice %24 {offsets = [0, 64], sizes = [8, 32], strides = [1, 1]} : vector<8x96xf32> to vector<8x32xf32>
    %28 = vector.extract_strided_slice %18 {offsets = [0, 96], sizes = [8, 32], strides = [1, 1]} : vector<8x128xf32> to vector<8x32xf32>
    %29 = math.tanh %28 : vector<8x32xf32>
    %30 = arith.mulf %26, %13 : vector<8x32xf32>
    %31 = arith.mulf %25, %29 : vector<8x32xf32>
    %32 = arith.addf %30, %31 : vector<8x32xf32>
    %33 = math.tanh %32 : vector<8x32xf32>
    %34 = arith.mulf %27, %33 : vector<8x32xf32>
    %35 = arith.index_cast %c0_i32 : i32 to index
    %c0_21 = arith.constant 0 : index
    %c0_22 = arith.constant 0 : index
    %36 = vector.load %arg17[%35, %c0_21, %c0_22] : memref<8x8x32xf32, #tpu.memory_space<vmem>>, vector<1x8x32xf32>
    %37 = vector.shape_cast %36 : vector<1x8x32xf32> to vector<8x32xf32>
    %38 = vector.shape_cast %34 : vector<8x32xf32> to vector<1x8x32xf32>
    tpu.vector_store %arg17[%35, %c0_21, %c0_22], %38 {strides = array<i32>} : memref<8x8x32xf32, #tpu.memory_space<vmem>>, vector<1x8x32xf32>,
    %c1_i32 = arith.constant 1 : i32
    %39 = arith.index_cast %c1_i32 : i32 to index
    %c0_23 = arith.constant 0 : index
    %c0_24 = arith.constant 0 : index
    %40 = vector.load %arg16[%39, %c0_23, %c0_24] : memref<8x8x128xf32, #tpu.memory_space<vmem>>, vector<1x8x128xf32>
    %41 = vector.shape_cast %40 : vector<1x8x128xf32> to vector<8x128xf32>
    %cst_25 = arith.constant dense<0.000000e+00> : vector<8x128xf32>
    %42 = tpu.matmul %34, %9, %cst_25 {dimension_numbers = #tpu.dot_dimension_numbers<[1], [0], [0], [1], [0, 0, 1, 1], [], []>} : vector<8x32xf32>, vector<32x128xf32>, vector<8x128xf32> -> vector<8x128xf32>
    %43 = arith.addf %41, %42 : vector<8x128xf32>
    %44 = vector.extract_strided_slice %43 {offsets = [0, 0], sizes = [8, 96], strides = [1, 1]} : vector<8x128xf32> to vector<8x96xf32>
    %45 = arith.negf %44 : vector<8x96xf32>
    %46 = math.exp %45 : vector<8x96xf32>
    %cst_26 = arith.constant 1.000000e+00 : f32
    %47 = vector.broadcast %cst_26 : f32 to vector<8x96xf32>
    %48 = arith.addf %47, %46 : vector<8x96xf32>
    %49 = arith.divf %47, %48 : vector<8x96xf32>
    %50 = vector.extract_strided_slice %49 {offsets = [0, 0], sizes = [8, 32], strides = [1, 1]} : vector<8x96xf32> to vector<8x32xf32>
    %51 = vector.extract_strided_slice %49 {offsets = [0, 32], sizes = [8, 32], strides = [1, 1]} : vector<8x96xf32> to vector<8x32xf32>
    %52 = vector.extract_strided_slice %49 {offsets = [0, 64], sizes = [8, 32], strides = [1, 1]} : vector<8x96xf32> to vector<8x32xf32>
    %53 = vector.extract_strided_slice %43 {offsets = [0, 96], sizes = [8, 32], strides = [1, 1]} : vector<8x128xf32> to vector<8x32xf32>
    %54 = math.tanh %53 : vector<8x32xf32>
    %55 = arith.mulf %51, %32 : vector<8x32xf32>
    %56 = arith.mulf %50, %54 : vector<8x32xf32>
    %57 = arith.addf %55, %56 : vector<8x32xf32>
    %58 = math.tanh %57 : vector<8x32xf32>
    %59 = arith.mulf %52, %58 : vector<8x32xf32>
    %60 = arith.index_cast %c1_i32 : i32 to index
    %c0_27 = arith.constant 0 : index
    %c0_28 = arith.constant 0 : index
    %61 = vector.load %arg17[%60, %c0_27, %c0_28] : memref<8x8x32xf32, #tpu.memory_space<vmem>>, vector<1x8x32xf32>
    %62 = vector.shape_cast %61 : vector<1x8x32xf32> to vector<8x32xf32>
    %63 = vector.shape_cast %59 : vector<8x32xf32> to vector<1x8x32xf32>
    tpu.vector_store %arg17[%60, %c0_27, %c0_28], %63 {strides = array<i32>} : memref<8x8x32xf32, #tpu.memory_space<vmem>>, vector<1x8x32xf32>,
    %c2_i32 = arith.constant 2 : i32
    %64 = arith.index_cast %c2_i32 : i32 to index
    %c0_29 = arith.constant 0 : index
    %c0_30 = arith.constant 0 : index
    %65 = vector.load %arg16[%64, %c0_29, %c0_30] : memref<8x8x128xf32, #tpu.memory_space<vmem>>, vector<1x8x128xf32>
    %66 = vector.shape_cast %65 : vector<1x8x128xf32> to vector<8x128xf32>
    %cst_31 = arith.constant dense<0.000000e+00> : vector<8x128xf32>
    %67 = tpu.matmul %59, %9, %cst_31 {dimension_numbers = #tpu.dot_dimension_numbers<[1], [0], [0], [1], [0, 0, 1, 1], [], []>} : vector<8x32xf32>, vector<32x128xf32>, vector<8x128xf32> -> vector<8x128xf32>
    %68 = arith.addf %66, %67 : vector<8x128xf32>
    %69 = vector.extract_strided_slice %68 {offsets = [0, 0], sizes = [8, 96], strides = [1, 1]} : vector<8x128xf32> to vector<8x96xf32>
    %70 = arith.negf %69 : vector<8x96xf32>
    %71 = math.exp %70 : vector<8x96xf32>
    %cst_32 = arith.constant 1.000000e+00 : f32
    %72 = vector.broadcast %cst_32 : f32 to vector<8x96xf32>
    %73 = arith.addf %72, %71 : vector<8x96xf32>
    %74 = arith.divf %72, %73 : vector<8x96xf32>
    %75 = vector.extract_strided_slice %74 {offsets = [0, 0], sizes = [8, 32], strides = [1, 1]} : vector<8x96xf32> to vector<8x32xf32>
    %76 = vector.extract_strided_slice %74 {offsets = [0, 32], sizes = [8, 32], strides = [1, 1]} : vector<8x96xf32> to vector<8x32xf32>
    %77 = vector.extract_strided_slice %74 {offsets = [0, 64], sizes = [8, 32], strides = [1, 1]} : vector<8x96xf32> to vector<8x32xf32>
    %78 = vector.extract_strided_slice %68 {offsets = [0, 96], sizes = [8, 32], strides = [1, 1]} : vector<8x128xf32> to vector<8x32xf32>
    %79 = math.tanh %78 : vector<8x32xf32>
    %80 = arith.mulf %76, %57 : vector<8x32xf32>
    %81 = arith.mulf %75, %79 : vector<8x32xf32>
    %82 = arith.addf %80, %81 : vector<8x32xf32>
    %83 = math.tanh %82 : vector<8x32xf32>
    %84 = arith.mulf %77, %83 : vector<8x32xf32>
    %85 = arith.index_cast %c2_i32 : i32 to index
    %c0_33 = arith.constant 0 : index
    %c0_34 = arith.constant 0 : index
    %86 = vector.load %arg17[%85, %c0_33, %c0_34] : memref<8x8x32xf32, #tpu.memory_space<vmem>>, vector<1x8x32xf32>
    %87 = vector.shape_cast %86 : vector<1x8x32xf32> to vector<8x32xf32>
    %88 = vector.shape_cast %84 : vector<8x32xf32> to vector<1x8x32xf32>
    tpu.vector_store %arg17[%85, %c0_33, %c0_34], %88 {strides = array<i32>} : memref<8x8x32xf32, #tpu.memory_space<vmem>>, vector<1x8x32xf32>,
    %c3_i32 = arith.constant 3 : i32
    %89 = arith.index_cast %c3_i32 : i32 to index
    %c0_35 = arith.constant 0 : index
    %c0_36 = arith.constant 0 : index
    %90 = vector.load %arg16[%89, %c0_35, %c0_36] : memref<8x8x128xf32, #tpu.memory_space<vmem>>, vector<1x8x128xf32>
    %91 = vector.shape_cast %90 : vector<1x8x128xf32> to vector<8x128xf32>
    %cst_37 = arith.constant dense<0.000000e+00> : vector<8x128xf32>
    %92 = tpu.matmul %84, %9, %cst_37 {dimension_numbers = #tpu.dot_dimension_numbers<[1], [0], [0], [1], [0, 0, 1, 1], [], []>} : vector<8x32xf32>, vector<32x128xf32>, vector<8x128xf32> -> vector<8x128xf32>
    %93 = arith.addf %91, %92 : vector<8x128xf32>
    %94 = vector.extract_strided_slice %93 {offsets = [0, 0], sizes = [8, 96], strides = [1, 1]} : vector<8x128xf32> to vector<8x96xf32>
    %95 = arith.negf %94 : vector<8x96xf32>
    %96 = math.exp %95 : vector<8x96xf32>
    %cst_38 = arith.constant 1.000000e+00 : f32
    %97 = vector.broadcast %cst_38 : f32 to vector<8x96xf32>
    %98 = arith.addf %97, %96 : vector<8x96xf32>
    %99 = arith.divf %97, %98 : vector<8x96xf32>
    %100 = vector.extract_strided_slice %99 {offsets = [0, 0], sizes = [8, 32], strides = [1, 1]} : vector<8x96xf32> to vector<8x32xf32>
    %101 = vector.extract_strided_slice %99 {offsets = [0, 32], sizes = [8, 32], strides = [1, 1]} : vector<8x96xf32> to vector<8x32xf32>
    %102 = vector.extract_strided_slice %99 {offsets = [0, 64], sizes = [8, 32], strides = [1, 1]} : vector<8x96xf32> to vector<8x32xf32>
    %103 = vector.extract_strided_slice %93 {offsets = [0, 96], sizes = [8, 32], strides = [1, 1]} : vector<8x128xf32> to vector<8x32xf32>
    %104 = math.tanh %103 : vector<8x32xf32>
    %105 = arith.mulf %101, %82 : vector<8x32xf32>
    %106 = arith.mulf %100, %104 : vector<8x32xf32>
    %107 = arith.addf %105, %106 : vector<8x32xf32>
    %108 = math.tanh %107 : vector<8x32xf32>
    %109 = arith.mulf %102, %108 : vector<8x32xf32>
    %110 = arith.index_cast %c3_i32 : i32 to index
    %c0_39 = arith.constant 0 : index
    %c0_40 = arith.constant 0 : index
    %111 = vector.load %arg17[%110, %c0_39, %c0_40] : memref<8x8x32xf32, #tpu.memory_space<vmem>>, vector<1x8x32xf32>
    %112 = vector.shape_cast %111 : vector<1x8x32xf32> to vector<8x32xf32>
    %113 = vector.shape_cast %109 : vector<8x32xf32> to vector<1x8x32xf32>
    tpu.vector_store %arg17[%110, %c0_39, %c0_40], %113 {strides = array<i32>} : memref<8x8x32xf32, #tpu.memory_space<vmem>>, vector<1x8x32xf32>,
    %c4_i32 = arith.constant 4 : i32
    %114 = arith.index_cast %c4_i32 : i32 to index
    %c0_41 = arith.constant 0 : index
    %c0_42 = arith.constant 0 : index
    %115 = vector.load %arg16[%114, %c0_41, %c0_42] : memref<8x8x128xf32, #tpu.memory_space<vmem>>, vector<1x8x128xf32>
    %116 = vector.shape_cast %115 : vector<1x8x128xf32> to vector<8x128xf32>
    %cst_43 = arith.constant dense<0.000000e+00> : vector<8x128xf32>
    %117 = tpu.matmul %109, %9, %cst_43 {dimension_numbers = #tpu.dot_dimension_numbers<[1], [0], [0], [1], [0, 0, 1, 1], [], []>} : vector<8x32xf32>, vector<32x128xf32>, vector<8x128xf32> -> vector<8x128xf32>
    %118 = arith.addf %116, %117 : vector<8x128xf32>
    %119 = vector.extract_strided_slice %118 {offsets = [0, 0], sizes = [8, 96], strides = [1, 1]} : vector<8x128xf32> to vector<8x96xf32>
    %120 = arith.negf %119 : vector<8x96xf32>
    %121 = math.exp %120 : vector<8x96xf32>
    %cst_44 = arith.constant 1.000000e+00 : f32
    %122 = vector.broadcast %cst_44 : f32 to vector<8x96xf32>
    %123 = arith.addf %122, %121 : vector<8x96xf32>
    %124 = arith.divf %122, %123 : vector<8x96xf32>
    %125 = vector.extract_strided_slice %124 {offsets = [0, 0], sizes = [8, 32], strides = [1, 1]} : vector<8x96xf32> to vector<8x32xf32>
    %126 = vector.extract_strided_slice %124 {offsets = [0, 32], sizes = [8, 32], strides = [1, 1]} : vector<8x96xf32> to vector<8x32xf32>
    %127 = vector.extract_strided_slice %124 {offsets = [0, 64], sizes = [8, 32], strides = [1, 1]} : vector<8x96xf32> to vector<8x32xf32>
    %128 = vector.extract_strided_slice %118 {offsets = [0, 96], sizes = [8, 32], strides = [1, 1]} : vector<8x128xf32> to vector<8x32xf32>
    %129 = math.tanh %128 : vector<8x32xf32>
    %130 = arith.mulf %126, %107 : vector<8x32xf32>
    %131 = arith.mulf %125, %129 : vector<8x32xf32>
    %132 = arith.addf %130, %131 : vector<8x32xf32>
    %133 = math.tanh %132 : vector<8x32xf32>
    %134 = arith.mulf %127, %133 : vector<8x32xf32>
    %135 = arith.index_cast %c4_i32 : i32 to index
    %c0_45 = arith.constant 0 : index
    %c0_46 = arith.constant 0 : index
    %136 = vector.load %arg17[%135, %c0_45, %c0_46] : memref<8x8x32xf32, #tpu.memory_space<vmem>>, vector<1x8x32xf32>
    %137 = vector.shape_cast %136 : vector<1x8x32xf32> to vector<8x32xf32>
    %138 = vector.shape_cast %134 : vector<8x32xf32> to vector<1x8x32xf32>
    tpu.vector_store %arg17[%135, %c0_45, %c0_46], %138 {strides = array<i32>} : memref<8x8x32xf32, #tpu.memory_space<vmem>>, vector<1x8x32xf32>,
    %c5_i32 = arith.constant 5 : i32
    %139 = arith.index_cast %c5_i32 : i32 to index
    %c0_47 = arith.constant 0 : index
    %c0_48 = arith.constant 0 : index
    %140 = vector.load %arg16[%139, %c0_47, %c0_48] : memref<8x8x128xf32, #tpu.memory_space<vmem>>, vector<1x8x128xf32>
    %141 = vector.shape_cast %140 : vector<1x8x128xf32> to vector<8x128xf32>
    %cst_49 = arith.constant dense<0.000000e+00> : vector<8x128xf32>
    %142 = tpu.matmul %134, %9, %cst_49 {dimension_numbers = #tpu.dot_dimension_numbers<[1], [0], [0], [1], [0, 0, 1, 1], [], []>} : vector<8x32xf32>, vector<32x128xf32>, vector<8x128xf32> -> vector<8x128xf32>
    %143 = arith.addf %141, %142 : vector<8x128xf32>
    %144 = vector.extract_strided_slice %143 {offsets = [0, 0], sizes = [8, 96], strides = [1, 1]} : vector<8x128xf32> to vector<8x96xf32>
    %145 = arith.negf %144 : vector<8x96xf32>
    %146 = math.exp %145 : vector<8x96xf32>
    %cst_50 = arith.constant 1.000000e+00 : f32
    %147 = vector.broadcast %cst_50 : f32 to vector<8x96xf32>
    %148 = arith.addf %147, %146 : vector<8x96xf32>
    %149 = arith.divf %147, %148 : vector<8x96xf32>
    %150 = vector.extract_strided_slice %149 {offsets = [0, 0], sizes = [8, 32], strides = [1, 1]} : vector<8x96xf32> to vector<8x32xf32>
    %151 = vector.extract_strided_slice %149 {offsets = [0, 32], sizes = [8, 32], strides = [1, 1]} : vector<8x96xf32> to vector<8x32xf32>
    %152 = vector.extract_strided_slice %149 {offsets = [0, 64], sizes = [8, 32], strides = [1, 1]} : vector<8x96xf32> to vector<8x32xf32>
    %153 = vector.extract_strided_slice %143 {offsets = [0, 96], sizes = [8, 32], strides = [1, 1]} : vector<8x128xf32> to vector<8x32xf32>
    %154 = math.tanh %153 : vector<8x32xf32>
    %155 = arith.mulf %151, %132 : vector<8x32xf32>
    %156 = arith.mulf %150, %154 : vector<8x32xf32>
    %157 = arith.addf %155, %156 : vector<8x32xf32>
    %158 = math.tanh %157 : vector<8x32xf32>
    %159 = arith.mulf %152, %158 : vector<8x32xf32>
    %160 = arith.index_cast %c5_i32 : i32 to index
    %c0_51 = arith.constant 0 : index
    %c0_52 = arith.constant 0 : index
    %161 = vector.load %arg17[%160, %c0_51, %c0_52] : memref<8x8x32xf32, #tpu.memory_space<vmem>>, vector<1x8x32xf32>
    %162 = vector.shape_cast %161 : vector<1x8x32xf32> to vector<8x32xf32>
    %163 = vector.shape_cast %159 : vector<8x32xf32> to vector<1x8x32xf32>
    tpu.vector_store %arg17[%160, %c0_51, %c0_52], %163 {strides = array<i32>} : memref<8x8x32xf32, #tpu.memory_space<vmem>>, vector<1x8x32xf32>,
    %c6_i32 = arith.constant 6 : i32
    %164 = arith.index_cast %c6_i32 : i32 to index
    %c0_53 = arith.constant 0 : index
    %c0_54 = arith.constant 0 : index
    %165 = vector.load %arg16[%164, %c0_53, %c0_54] : memref<8x8x128xf32, #tpu.memory_space<vmem>>, vector<1x8x128xf32>
    %166 = vector.shape_cast %165 : vector<1x8x128xf32> to vector<8x128xf32>
    %cst_55 = arith.constant dense<0.000000e+00> : vector<8x128xf32>
    %167 = tpu.matmul %159, %9, %cst_55 {dimension_numbers = #tpu.dot_dimension_numbers<[1], [0], [0], [1], [0, 0, 1, 1], [], []>} : vector<8x32xf32>, vector<32x128xf32>, vector<8x128xf32> -> vector<8x128xf32>
    %168 = arith.addf %166, %167 : vector<8x128xf32>
    %169 = vector.extract_strided_slice %168 {offsets = [0, 0], sizes = [8, 96], strides = [1, 1]} : vector<8x128xf32> to vector<8x96xf32>
    %170 = arith.negf %169 : vector<8x96xf32>
    %171 = math.exp %170 : vector<8x96xf32>
    %cst_56 = arith.constant 1.000000e+00 : f32
    %172 = vector.broadcast %cst_56 : f32 to vector<8x96xf32>
    %173 = arith.addf %172, %171 : vector<8x96xf32>
    %174 = arith.divf %172, %173 : vector<8x96xf32>
    %175 = vector.extract_strided_slice %174 {offsets = [0, 0], sizes = [8, 32], strides = [1, 1]} : vector<8x96xf32> to vector<8x32xf32>
    %176 = vector.extract_strided_slice %174 {offsets = [0, 32], sizes = [8, 32], strides = [1, 1]} : vector<8x96xf32> to vector<8x32xf32>
    %177 = vector.extract_strided_slice %174 {offsets = [0, 64], sizes = [8, 32], strides = [1, 1]} : vector<8x96xf32> to vector<8x32xf32>
    %178 = vector.extract_strided_slice %168 {offsets = [0, 96], sizes = [8, 32], strides = [1, 1]} : vector<8x128xf32> to vector<8x32xf32>
    %179 = math.tanh %178 : vector<8x32xf32>
    %180 = arith.mulf %176, %157 : vector<8x32xf32>
    %181 = arith.mulf %175, %179 : vector<8x32xf32>
    %182 = arith.addf %180, %181 : vector<8x32xf32>
    %183 = math.tanh %182 : vector<8x32xf32>
    %184 = arith.mulf %177, %183 : vector<8x32xf32>
    %185 = arith.index_cast %c6_i32 : i32 to index
    %c0_57 = arith.constant 0 : index
    %c0_58 = arith.constant 0 : index
    %186 = vector.load %arg17[%185, %c0_57, %c0_58] : memref<8x8x32xf32, #tpu.memory_space<vmem>>, vector<1x8x32xf32>
    %187 = vector.shape_cast %186 : vector<1x8x32xf32> to vector<8x32xf32>
    %188 = vector.shape_cast %184 : vector<8x32xf32> to vector<1x8x32xf32>
    tpu.vector_store %arg17[%185, %c0_57, %c0_58], %188 {strides = array<i32>} : memref<8x8x32xf32, #tpu.memory_space<vmem>>, vector<1x8x32xf32>,
    %c7_i32 = arith.constant 7 : i32
    %189 = arith.index_cast %c7_i32 : i32 to index
    %c0_59 = arith.constant 0 : index
    %c0_60 = arith.constant 0 : index
    %190 = vector.load %arg16[%189, %c0_59, %c0_60] : memref<8x8x128xf32, #tpu.memory_space<vmem>>, vector<1x8x128xf32>
    %191 = vector.shape_cast %190 : vector<1x8x128xf32> to vector<8x128xf32>
    %cst_61 = arith.constant dense<0.000000e+00> : vector<8x128xf32>
    %192 = tpu.matmul %184, %9, %cst_61 {dimension_numbers = #tpu.dot_dimension_numbers<[1], [0], [0], [1], [0, 0, 1, 1], [], []>} : vector<8x32xf32>, vector<32x128xf32>, vector<8x128xf32> -> vector<8x128xf32>
    %193 = arith.addf %191, %192 : vector<8x128xf32>
    %194 = vector.extract_strided_slice %193 {offsets = [0, 0], sizes = [8, 96], strides = [1, 1]} : vector<8x128xf32> to vector<8x96xf32>
    %195 = arith.negf %194 : vector<8x96xf32>
    %196 = math.exp %195 : vector<8x96xf32>
    %cst_62 = arith.constant 1.000000e+00 : f32
    %197 = vector.broadcast %cst_62 : f32 to vector<8x96xf32>
    %198 = arith.addf %197, %196 : vector<8x96xf32>
    %199 = arith.divf %197, %198 : vector<8x96xf32>
    %200 = vector.extract_strided_slice %199 {offsets = [0, 0], sizes = [8, 32], strides = [1, 1]} : vector<8x96xf32> to vector<8x32xf32>
    %201 = vector.extract_strided_slice %199 {offsets = [0, 32], sizes = [8, 32], strides = [1, 1]} : vector<8x96xf32> to vector<8x32xf32>
    %202 = vector.extract_strided_slice %199 {offsets = [0, 64], sizes = [8, 32], strides = [1, 1]} : vector<8x96xf32> to vector<8x32xf32>
    %203 = vector.extract_strided_slice %193 {offsets = [0, 96], sizes = [8, 32], strides = [1, 1]} : vector<8x128xf32> to vector<8x32xf32>
    %204 = math.tanh %203 : vector<8x32xf32>
    %205 = arith.mulf %201, %182 : vector<8x32xf32>
    %206 = arith.mulf %200, %204 : vector<8x32xf32>
    %207 = arith.addf %205, %206 : vector<8x32xf32>
    %208 = math.tanh %207 : vector<8x32xf32>
    %209 = arith.mulf %202, %208 : vector<8x32xf32>
    %210 = arith.index_cast %c7_i32 : i32 to index
    %c0_63 = arith.constant 0 : index
    %c0_64 = arith.constant 0 : index
    %211 = vector.load %arg17[%210, %c0_63, %c0_64] : memref<8x8x32xf32, #tpu.memory_space<vmem>>, vector<1x8x32xf32>
    %212 = vector.shape_cast %211 : vector<1x8x32xf32> to vector<8x32xf32>
    %213 = vector.shape_cast %209 : vector<8x32xf32> to vector<1x8x32xf32>
    tpu.vector_store %arg17[%210, %c0_63, %c0_64], %213 {strides = array<i32>} : memref<8x8x32xf32, #tpu.memory_space<vmem>>, vector<1x8x32xf32>,
    %c8_i32 = arith.constant 8 : i32
    %c0_65 = arith.constant 0 : index
    %c0_66 = arith.constant 0 : index
    %c0_67 = arith.constant 0 : index
    %214 = vector.load %arg14[%c0_65, %c0_66, %c0_67] : memref<2x8x32xf32, #tpu.memory_space<vmem>>, vector<1x8x32xf32>
    %215 = vector.shape_cast %214 : vector<1x8x32xf32> to vector<8x32xf32>
    %216 = vector.shape_cast %209 : vector<8x32xf32> to vector<1x8x32xf32>
    tpu.vector_store %arg14[%c0_65, %c0_66, %c0_67], %216 {strides = array<i32>} : memref<2x8x32xf32, #tpu.memory_space<vmem>>, vector<1x8x32xf32>,
    %c0_68 = arith.constant 0 : index
    %c0_69 = arith.constant 0 : index
    %c0_70 = arith.constant 0 : index
    %217 = vector.load %arg15[%c0_68, %c0_69, %c0_70] : memref<2x8x32xf32, #tpu.memory_space<vmem>>, vector<1x8x32xf32>
    %218 = vector.shape_cast %217 : vector<1x8x32xf32> to vector<8x32xf32>
    %219 = vector.shape_cast %207 : vector<8x32xf32> to vector<1x8x32xf32>
    tpu.vector_store %arg15[%c0_68, %c0_69, %c0_70], %219 {strides = array<i32>} : memref<2x8x32xf32, #tpu.memory_space<vmem>>, vector<1x8x32xf32>,
    %c0_71 = arith.constant 0 : index
    %c0_72 = arith.constant 0 : index
    %c0_73 = arith.constant 0 : index
    %220 = vector.load %arg17[%c0_71, %c0_72, %c0_73] : memref<8x8x32xf32, #tpu.memory_space<vmem>>, vector<8x8x32xf32>
    %221 = vector.shape_cast %220 : vector<8x8x32xf32> to vector<64x32xf32>
    %c0_74 = arith.constant 0 : index
    %c0_75 = arith.constant 0 : index
    %222 = vector.load %arg4[%c0_74, %c0_75] : memref<32x128xf32, #tpu.memory_space<vmem>>, vector<32x128xf32>
    %cst_76 = arith.constant dense<0.000000e+00> : vector<64x128xf32>
    %223 = tpu.matmul %221, %222, %cst_76 {dimension_numbers = #tpu.dot_dimension_numbers<[1], [0], [0], [1], [0, 0, 1, 1], [], []>} : vector<64x32xf32>, vector<32x128xf32>, vector<64x128xf32> -> vector<64x128xf32>
    %c0_77 = arith.constant 0 : index
    %c0_78 = arith.constant 0 : index
    %224 = vector.load %arg8[%c0_77, %c0_78] : memref<1x128xf32, #tpu.memory_space<vmem>>, vector<1x128xf32>
    %225 = vector.broadcast %224 : vector<1x128xf32> to vector<64x128xf32>
    %226 = arith.addf %223, %225 : vector<64x128xf32>
    %227 = vector.shape_cast %226 : vector<64x128xf32> to vector<8x8x128xf32>
    %c0_79 = arith.constant 0 : index
    %c0_80 = arith.constant 0 : index
    %c0_81 = arith.constant 0 : index
    %228 = vector.load %arg16[%c0_79, %c0_80, %c0_81] : memref<8x8x128xf32, #tpu.memory_space<vmem>>, vector<8x8x128xf32>
    tpu.vector_store %arg16[%c0_79, %c0_80, %c0_81], %227 {strides = array<i32>} : memref<8x8x128xf32, #tpu.memory_space<vmem>>, vector<8x8x128xf32>,
    %c0_82 = arith.constant 0 : index
    %c0_83 = arith.constant 0 : index
    %229 = vector.load %arg6[%c0_82, %c0_83] : memref<32x128xf32, #tpu.memory_space<vmem>>, vector<32x128xf32>
    %c1 = arith.constant 1 : index
    %c0_84 = arith.constant 0 : index
    %c0_85 = arith.constant 0 : index
    %230 = vector.load %arg1[%c1, %c0_84, %c0_85] : memref<2x8x32xf32, #tpu.memory_space<vmem>>, vector<1x8x32xf32>
    %231 = vector.shape_cast %230 : vector<1x8x32xf32> to vector<8x32xf32>
    %c1_86 = arith.constant 1 : index
    %c0_87 = arith.constant 0 : index
    %c0_88 = arith.constant 0 : index
    %232 = vector.load %arg2[%c1_86, %c0_87, %c0_88] : memref<2x8x32xf32, #tpu.memory_space<vmem>>, vector<1x8x32xf32>
    %233 = vector.shape_cast %232 : vector<1x8x32xf32> to vector<8x32xf32>
    %c0_i32_89 = arith.constant 0 : i32
    %234 = arith.index_cast %c0_i32_89 : i32 to index
    %c0_90 = arith.constant 0 : index
    %c0_91 = arith.constant 0 : index
    %235 = vector.load %arg16[%234, %c0_90, %c0_91] : memref<8x8x128xf32, #tpu.memory_space<vmem>>, vector<1x8x128xf32>
    %236 = vector.shape_cast %235 : vector<1x8x128xf32> to vector<8x128xf32>
    %cst_92 = arith.constant dense<0.000000e+00> : vector<8x128xf32>
    %237 = tpu.matmul %231, %229, %cst_92 {dimension_numbers = #tpu.dot_dimension_numbers<[1], [0], [0], [1], [0, 0, 1, 1], [], []>} : vector<8x32xf32>, vector<32x128xf32>, vector<8x128xf32> -> vector<8x128xf32>
    %238 = arith.addf %236, %237 : vector<8x128xf32>
    %239 = vector.extract_strided_slice %238 {offsets = [0, 0], sizes = [8, 96], strides = [1, 1]} : vector<8x128xf32> to vector<8x96xf32>
    %240 = arith.negf %239 : vector<8x96xf32>
    %241 = math.exp %240 : vector<8x96xf32>
    %cst_93 = arith.constant 1.000000e+00 : f32
    %242 = vector.broadcast %cst_93 : f32 to vector<8x96xf32>
    %243 = arith.addf %242, %241 : vector<8x96xf32>
    %244 = arith.divf %242, %243 : vector<8x96xf32>
    %245 = vector.extract_strided_slice %244 {offsets = [0, 0], sizes = [8, 32], strides = [1, 1]} : vector<8x96xf32> to vector<8x32xf32>
    %246 = vector.extract_strided_slice %244 {offsets = [0, 32], sizes = [8, 32], strides = [1, 1]} : vector<8x96xf32> to vector<8x32xf32>
    %247 = vector.extract_strided_slice %244 {offsets = [0, 64], sizes = [8, 32], strides = [1, 1]} : vector<8x96xf32> to vector<8x32xf32>
    %248 = vector.extract_strided_slice %238 {offsets = [0, 96], sizes = [8, 32], strides = [1, 1]} : vector<8x128xf32> to vector<8x32xf32>
    %249 = math.tanh %248 : vector<8x32xf32>
    %250 = arith.mulf %246, %233 : vector<8x32xf32>
    %251 = arith.mulf %245, %249 : vector<8x32xf32>
    %252 = arith.addf %250, %251 : vector<8x32xf32>
    %253 = math.tanh %252 : vector<8x32xf32>
    %254 = arith.mulf %247, %253 : vector<8x32xf32>
    %255 = arith.index_cast %c0_i32_89 : i32 to index
    %c0_94 = arith.constant 0 : index
    %c0_95 = arith.constant 0 : index
    %256 = vector.load %arg17[%255, %c0_94, %c0_95] : memref<8x8x32xf32, #tpu.memory_space<vmem>>, vector<1x8x32xf32>
    %257 = vector.shape_cast %256 : vector<1x8x32xf32> to vector<8x32xf32>
    %258 = vector.shape_cast %254 : vector<8x32xf32> to vector<1x8x32xf32>
    tpu.vector_store %arg17[%255, %c0_94, %c0_95], %258 {strides = array<i32>} : memref<8x8x32xf32, #tpu.memory_space<vmem>>, vector<1x8x32xf32>,
    %c1_i32_96 = arith.constant 1 : i32
    %259 = arith.index_cast %c1_i32_96 : i32 to index
    %c0_97 = arith.constant 0 : index
    %c0_98 = arith.constant 0 : index
    %260 = vector.load %arg16[%259, %c0_97, %c0_98] : memref<8x8x128xf32, #tpu.memory_space<vmem>>, vector<1x8x128xf32>
    %261 = vector.shape_cast %260 : vector<1x8x128xf32> to vector<8x128xf32>
    %cst_99 = arith.constant dense<0.000000e+00> : vector<8x128xf32>
    %262 = tpu.matmul %254, %229, %cst_99 {dimension_numbers = #tpu.dot_dimension_numbers<[1], [0], [0], [1], [0, 0, 1, 1], [], []>} : vector<8x32xf32>, vector<32x128xf32>, vector<8x128xf32> -> vector<8x128xf32>
    %263 = arith.addf %261, %262 : vector<8x128xf32>
    %264 = vector.extract_strided_slice %263 {offsets = [0, 0], sizes = [8, 96], strides = [1, 1]} : vector<8x128xf32> to vector<8x96xf32>
    %265 = arith.negf %264 : vector<8x96xf32>
    %266 = math.exp %265 : vector<8x96xf32>
    %cst_100 = arith.constant 1.000000e+00 : f32
    %267 = vector.broadcast %cst_100 : f32 to vector<8x96xf32>
    %268 = arith.addf %267, %266 : vector<8x96xf32>
    %269 = arith.divf %267, %268 : vector<8x96xf32>
    %270 = vector.extract_strided_slice %269 {offsets = [0, 0], sizes = [8, 32], strides = [1, 1]} : vector<8x96xf32> to vector<8x32xf32>
    %271 = vector.extract_strided_slice %269 {offsets = [0, 32], sizes = [8, 32], strides = [1, 1]} : vector<8x96xf32> to vector<8x32xf32>
    %272 = vector.extract_strided_slice %269 {offsets = [0, 64], sizes = [8, 32], strides = [1, 1]} : vector<8x96xf32> to vector<8x32xf32>
    %273 = vector.extract_strided_slice %263 {offsets = [0, 96], sizes = [8, 32], strides = [1, 1]} : vector<8x128xf32> to vector<8x32xf32>
    %274 = math.tanh %273 : vector<8x32xf32>
    %275 = arith.mulf %271, %252 : vector<8x32xf32>
    %276 = arith.mulf %270, %274 : vector<8x32xf32>
    %277 = arith.addf %275, %276 : vector<8x32xf32>
    %278 = math.tanh %277 : vector<8x32xf32>
    %279 = arith.mulf %272, %278 : vector<8x32xf32>
    %280 = arith.index_cast %c1_i32_96 : i32 to index
    %c0_101 = arith.constant 0 : index
    %c0_102 = arith.constant 0 : index
    %281 = vector.load %arg17[%280, %c0_101, %c0_102] : memref<8x8x32xf32, #tpu.memory_space<vmem>>, vector<1x8x32xf32>
    %282 = vector.shape_cast %281 : vector<1x8x32xf32> to vector<8x32xf32>
    %283 = vector.shape_cast %279 : vector<8x32xf32> to vector<1x8x32xf32>
    tpu.vector_store %arg17[%280, %c0_101, %c0_102], %283 {strides = array<i32>} : memref<8x8x32xf32, #tpu.memory_space<vmem>>, vector<1x8x32xf32>,
    %c2_i32_103 = arith.constant 2 : i32
    %284 = arith.index_cast %c2_i32_103 : i32 to index
    %c0_104 = arith.constant 0 : index
    %c0_105 = arith.constant 0 : index
    %285 = vector.load %arg16[%284, %c0_104, %c0_105] : memref<8x8x128xf32, #tpu.memory_space<vmem>>, vector<1x8x128xf32>
    %286 = vector.shape_cast %285 : vector<1x8x128xf32> to vector<8x128xf32>
    %cst_106 = arith.constant dense<0.000000e+00> : vector<8x128xf32>
    %287 = tpu.matmul %279, %229, %cst_106 {dimension_numbers = #tpu.dot_dimension_numbers<[1], [0], [0], [1], [0, 0, 1, 1], [], []>} : vector<8x32xf32>, vector<32x128xf32>, vector<8x128xf32> -> vector<8x128xf32>
    %288 = arith.addf %286, %287 : vector<8x128xf32>
    %289 = vector.extract_strided_slice %288 {offsets = [0, 0], sizes = [8, 96], strides = [1, 1]} : vector<8x128xf32> to vector<8x96xf32>
    %290 = arith.negf %289 : vector<8x96xf32>
    %291 = math.exp %290 : vector<8x96xf32>
    %cst_107 = arith.constant 1.000000e+00 : f32
    %292 = vector.broadcast %cst_107 : f32 to vector<8x96xf32>
    %293 = arith.addf %292, %291 : vector<8x96xf32>
    %294 = arith.divf %292, %293 : vector<8x96xf32>
    %295 = vector.extract_strided_slice %294 {offsets = [0, 0], sizes = [8, 32], strides = [1, 1]} : vector<8x96xf32> to vector<8x32xf32>
    %296 = vector.extract_strided_slice %294 {offsets = [0, 32], sizes = [8, 32], strides = [1, 1]} : vector<8x96xf32> to vector<8x32xf32>
    %297 = vector.extract_strided_slice %294 {offsets = [0, 64], sizes = [8, 32], strides = [1, 1]} : vector<8x96xf32> to vector<8x32xf32>
    %298 = vector.extract_strided_slice %288 {offsets = [0, 96], sizes = [8, 32], strides = [1, 1]} : vector<8x128xf32> to vector<8x32xf32>
    %299 = math.tanh %298 : vector<8x32xf32>
    %300 = arith.mulf %296, %277 : vector<8x32xf32>
    %301 = arith.mulf %295, %299 : vector<8x32xf32>
    %302 = arith.addf %300, %301 : vector<8x32xf32>
    %303 = math.tanh %302 : vector<8x32xf32>
    %304 = arith.mulf %297, %303 : vector<8x32xf32>
    %305 = arith.index_cast %c2_i32_103 : i32 to index
    %c0_108 = arith.constant 0 : index
    %c0_109 = arith.constant 0 : index
    %306 = vector.load %arg17[%305, %c0_108, %c0_109] : memref<8x8x32xf32, #tpu.memory_space<vmem>>, vector<1x8x32xf32>
    %307 = vector.shape_cast %306 : vector<1x8x32xf32> to vector<8x32xf32>
    %308 = vector.shape_cast %304 : vector<8x32xf32> to vector<1x8x32xf32>
    tpu.vector_store %arg17[%305, %c0_108, %c0_109], %308 {strides = array<i32>} : memref<8x8x32xf32, #tpu.memory_space<vmem>>, vector<1x8x32xf32>,
    %c3_i32_110 = arith.constant 3 : i32
    %309 = arith.index_cast %c3_i32_110 : i32 to index
    %c0_111 = arith.constant 0 : index
    %c0_112 = arith.constant 0 : index
    %310 = vector.load %arg16[%309, %c0_111, %c0_112] : memref<8x8x128xf32, #tpu.memory_space<vmem>>, vector<1x8x128xf32>
    %311 = vector.shape_cast %310 : vector<1x8x128xf32> to vector<8x128xf32>
    %cst_113 = arith.constant dense<0.000000e+00> : vector<8x128xf32>
    %312 = tpu.matmul %304, %229, %cst_113 {dimension_numbers = #tpu.dot_dimension_numbers<[1], [0], [0], [1], [0, 0, 1, 1], [], []>} : vector<8x32xf32>, vector<32x128xf32>, vector<8x128xf32> -> vector<8x128xf32>
    %313 = arith.addf %311, %312 : vector<8x128xf32>
    %314 = vector.extract_strided_slice %313 {offsets = [0, 0], sizes = [8, 96], strides = [1, 1]} : vector<8x128xf32> to vector<8x96xf32>
    %315 = arith.negf %314 : vector<8x96xf32>
    %316 = math.exp %315 : vector<8x96xf32>
    %cst_114 = arith.constant 1.000000e+00 : f32
    %317 = vector.broadcast %cst_114 : f32 to vector<8x96xf32>
    %318 = arith.addf %317, %316 : vector<8x96xf32>
    %319 = arith.divf %317, %318 : vector<8x96xf32>
    %320 = vector.extract_strided_slice %319 {offsets = [0, 0], sizes = [8, 32], strides = [1, 1]} : vector<8x96xf32> to vector<8x32xf32>
    %321 = vector.extract_strided_slice %319 {offsets = [0, 32], sizes = [8, 32], strides = [1, 1]} : vector<8x96xf32> to vector<8x32xf32>
    %322 = vector.extract_strided_slice %319 {offsets = [0, 64], sizes = [8, 32], strides = [1, 1]} : vector<8x96xf32> to vector<8x32xf32>
    %323 = vector.extract_strided_slice %313 {offsets = [0, 96], sizes = [8, 32], strides = [1, 1]} : vector<8x128xf32> to vector<8x32xf32>
    %324 = math.tanh %323 : vector<8x32xf32>
    %325 = arith.mulf %321, %302 : vector<8x32xf32>
    %326 = arith.mulf %320, %324 : vector<8x32xf32>
    %327 = arith.addf %325, %326 : vector<8x32xf32>
    %328 = math.tanh %327 : vector<8x32xf32>
    %329 = arith.mulf %322, %328 : vector<8x32xf32>
    %330 = arith.index_cast %c3_i32_110 : i32 to index
    %c0_115 = arith.constant 0 : index
    %c0_116 = arith.constant 0 : index
    %331 = vector.load %arg17[%330, %c0_115, %c0_116] : memref<8x8x32xf32, #tpu.memory_space<vmem>>, vector<1x8x32xf32>
    %332 = vector.shape_cast %331 : vector<1x8x32xf32> to vector<8x32xf32>
    %333 = vector.shape_cast %329 : vector<8x32xf32> to vector<1x8x32xf32>
    tpu.vector_store %arg17[%330, %c0_115, %c0_116], %333 {strides = array<i32>} : memref<8x8x32xf32, #tpu.memory_space<vmem>>, vector<1x8x32xf32>,
    %c4_i32_117 = arith.constant 4 : i32
    %334 = arith.index_cast %c4_i32_117 : i32 to index
    %c0_118 = arith.constant 0 : index
    %c0_119 = arith.constant 0 : index
    %335 = vector.load %arg16[%334, %c0_118, %c0_119] : memref<8x8x128xf32, #tpu.memory_space<vmem>>, vector<1x8x128xf32>
    %336 = vector.shape_cast %335 : vector<1x8x128xf32> to vector<8x128xf32>
    %cst_120 = arith.constant dense<0.000000e+00> : vector<8x128xf32>
    %337 = tpu.matmul %329, %229, %cst_120 {dimension_numbers = #tpu.dot_dimension_numbers<[1], [0], [0], [1], [0, 0, 1, 1], [], []>} : vector<8x32xf32>, vector<32x128xf32>, vector<8x128xf32> -> vector<8x128xf32>
    %338 = arith.addf %336, %337 : vector<8x128xf32>
    %339 = vector.extract_strided_slice %338 {offsets = [0, 0], sizes = [8, 96], strides = [1, 1]} : vector<8x128xf32> to vector<8x96xf32>
    %340 = arith.negf %339 : vector<8x96xf32>
    %341 = math.exp %340 : vector<8x96xf32>
    %cst_121 = arith.constant 1.000000e+00 : f32
    %342 = vector.broadcast %cst_121 : f32 to vector<8x96xf32>
    %343 = arith.addf %342, %341 : vector<8x96xf32>
    %344 = arith.divf %342, %343 : vector<8x96xf32>
    %345 = vector.extract_strided_slice %344 {offsets = [0, 0], sizes = [8, 32], strides = [1, 1]} : vector<8x96xf32> to vector<8x32xf32>
    %346 = vector.extract_strided_slice %344 {offsets = [0, 32], sizes = [8, 32], strides = [1, 1]} : vector<8x96xf32> to vector<8x32xf32>
    %347 = vector.extract_strided_slice %344 {offsets = [0, 64], sizes = [8, 32], strides = [1, 1]} : vector<8x96xf32> to vector<8x32xf32>
    %348 = vector.extract_strided_slice %338 {offsets = [0, 96], sizes = [8, 32], strides = [1, 1]} : vector<8x128xf32> to vector<8x32xf32>
    %349 = math.tanh %348 : vector<8x32xf32>
    %350 = arith.mulf %346, %327 : vector<8x32xf32>
    %351 = arith.mulf %345, %349 : vector<8x32xf32>
    %352 = arith.addf %350, %351 : vector<8x32xf32>
    %353 = math.tanh %352 : vector<8x32xf32>
    %354 = arith.mulf %347, %353 : vector<8x32xf32>
    %355 = arith.index_cast %c4_i32_117 : i32 to index
    %c0_122 = arith.constant 0 : index
    %c0_123 = arith.constant 0 : index
    %356 = vector.load %arg17[%355, %c0_122, %c0_123] : memref<8x8x32xf32, #tpu.memory_space<vmem>>, vector<1x8x32xf32>
    %357 = vector.shape_cast %356 : vector<1x8x32xf32> to vector<8x32xf32>
    %358 = vector.shape_cast %354 : vector<8x32xf32> to vector<1x8x32xf32>
    tpu.vector_store %arg17[%355, %c0_122, %c0_123], %358 {strides = array<i32>} : memref<8x8x32xf32, #tpu.memory_space<vmem>>, vector<1x8x32xf32>,
    %c5_i32_124 = arith.constant 5 : i32
    %359 = arith.index_cast %c5_i32_124 : i32 to index
    %c0_125 = arith.constant 0 : index
    %c0_126 = arith.constant 0 : index
    %360 = vector.load %arg16[%359, %c0_125, %c0_126] : memref<8x8x128xf32, #tpu.memory_space<vmem>>, vector<1x8x128xf32>
    %361 = vector.shape_cast %360 : vector<1x8x128xf32> to vector<8x128xf32>
    %cst_127 = arith.constant dense<0.000000e+00> : vector<8x128xf32>
    %362 = tpu.matmul %354, %229, %cst_127 {dimension_numbers = #tpu.dot_dimension_numbers<[1], [0], [0], [1], [0, 0, 1, 1], [], []>} : vector<8x32xf32>, vector<32x128xf32>, vector<8x128xf32> -> vector<8x128xf32>
    %363 = arith.addf %361, %362 : vector<8x128xf32>
    %364 = vector.extract_strided_slice %363 {offsets = [0, 0], sizes = [8, 96], strides = [1, 1]} : vector<8x128xf32> to vector<8x96xf32>
    %365 = arith.negf %364 : vector<8x96xf32>
    %366 = math.exp %365 : vector<8x96xf32>
    %cst_128 = arith.constant 1.000000e+00 : f32
    %367 = vector.broadcast %cst_128 : f32 to vector<8x96xf32>
    %368 = arith.addf %367, %366 : vector<8x96xf32>
    %369 = arith.divf %367, %368 : vector<8x96xf32>
    %370 = vector.extract_strided_slice %369 {offsets = [0, 0], sizes = [8, 32], strides = [1, 1]} : vector<8x96xf32> to vector<8x32xf32>
    %371 = vector.extract_strided_slice %369 {offsets = [0, 32], sizes = [8, 32], strides = [1, 1]} : vector<8x96xf32> to vector<8x32xf32>
    %372 = vector.extract_strided_slice %369 {offsets = [0, 64], sizes = [8, 32], strides = [1, 1]} : vector<8x96xf32> to vector<8x32xf32>
    %373 = vector.extract_strided_slice %363 {offsets = [0, 96], sizes = [8, 32], strides = [1, 1]} : vector<8x128xf32> to vector<8x32xf32>
    %374 = math.tanh %373 : vector<8x32xf32>
    %375 = arith.mulf %371, %352 : vector<8x32xf32>
    %376 = arith.mulf %370, %374 : vector<8x32xf32>
    %377 = arith.addf %375, %376 : vector<8x32xf32>
    %378 = math.tanh %377 : vector<8x32xf32>
    %379 = arith.mulf %372, %378 : vector<8x32xf32>
    %380 = arith.index_cast %c5_i32_124 : i32 to index
    %c0_129 = arith.constant 0 : index
    %c0_130 = arith.constant 0 : index
    %381 = vector.load %arg17[%380, %c0_129, %c0_130] : memref<8x8x32xf32, #tpu.memory_space<vmem>>, vector<1x8x32xf32>
    %382 = vector.shape_cast %381 : vector<1x8x32xf32> to vector<8x32xf32>
    %383 = vector.shape_cast %379 : vector<8x32xf32> to vector<1x8x32xf32>
    tpu.vector_store %arg17[%380, %c0_129, %c0_130], %383 {strides = array<i32>} : memref<8x8x32xf32, #tpu.memory_space<vmem>>, vector<1x8x32xf32>,
    %c6_i32_131 = arith.constant 6 : i32
    %384 = arith.index_cast %c6_i32_131 : i32 to index
    %c0_132 = arith.constant 0 : index
    %c0_133 = arith.constant 0 : index
    %385 = vector.load %arg16[%384, %c0_132, %c0_133] : memref<8x8x128xf32, #tpu.memory_space<vmem>>, vector<1x8x128xf32>
    %386 = vector.shape_cast %385 : vector<1x8x128xf32> to vector<8x128xf32>
    %cst_134 = arith.constant dense<0.000000e+00> : vector<8x128xf32>
    %387 = tpu.matmul %379, %229, %cst_134 {dimension_numbers = #tpu.dot_dimension_numbers<[1], [0], [0], [1], [0, 0, 1, 1], [], []>} : vector<8x32xf32>, vector<32x128xf32>, vector<8x128xf32> -> vector<8x128xf32>
    %388 = arith.addf %386, %387 : vector<8x128xf32>
    %389 = vector.extract_strided_slice %388 {offsets = [0, 0], sizes = [8, 96], strides = [1, 1]} : vector<8x128xf32> to vector<8x96xf32>
    %390 = arith.negf %389 : vector<8x96xf32>
    %391 = math.exp %390 : vector<8x96xf32>
    %cst_135 = arith.constant 1.000000e+00 : f32
    %392 = vector.broadcast %cst_135 : f32 to vector<8x96xf32>
    %393 = arith.addf %392, %391 : vector<8x96xf32>
    %394 = arith.divf %392, %393 : vector<8x96xf32>
    %395 = vector.extract_strided_slice %394 {offsets = [0, 0], sizes = [8, 32], strides = [1, 1]} : vector<8x96xf32> to vector<8x32xf32>
    %396 = vector.extract_strided_slice %394 {offsets = [0, 32], sizes = [8, 32], strides = [1, 1]} : vector<8x96xf32> to vector<8x32xf32>
    %397 = vector.extract_strided_slice %394 {offsets = [0, 64], sizes = [8, 32], strides = [1, 1]} : vector<8x96xf32> to vector<8x32xf32>
    %398 = vector.extract_strided_slice %388 {offsets = [0, 96], sizes = [8, 32], strides = [1, 1]} : vector<8x128xf32> to vector<8x32xf32>
    %399 = math.tanh %398 : vector<8x32xf32>
    %400 = arith.mulf %396, %377 : vector<8x32xf32>
    %401 = arith.mulf %395, %399 : vector<8x32xf32>
    %402 = arith.addf %400, %401 : vector<8x32xf32>
    %403 = math.tanh %402 : vector<8x32xf32>
    %404 = arith.mulf %397, %403 : vector<8x32xf32>
    %405 = arith.index_cast %c6_i32_131 : i32 to index
    %c0_136 = arith.constant 0 : index
    %c0_137 = arith.constant 0 : index
    %406 = vector.load %arg17[%405, %c0_136, %c0_137] : memref<8x8x32xf32, #tpu.memory_space<vmem>>, vector<1x8x32xf32>
    %407 = vector.shape_cast %406 : vector<1x8x32xf32> to vector<8x32xf32>
    %408 = vector.shape_cast %404 : vector<8x32xf32> to vector<1x8x32xf32>
    tpu.vector_store %arg17[%405, %c0_136, %c0_137], %408 {strides = array<i32>} : memref<8x8x32xf32, #tpu.memory_space<vmem>>, vector<1x8x32xf32>,
    %c7_i32_138 = arith.constant 7 : i32
    %409 = arith.index_cast %c7_i32_138 : i32 to index
    %c0_139 = arith.constant 0 : index
    %c0_140 = arith.constant 0 : index
    %410 = vector.load %arg16[%409, %c0_139, %c0_140] : memref<8x8x128xf32, #tpu.memory_space<vmem>>, vector<1x8x128xf32>
    %411 = vector.shape_cast %410 : vector<1x8x128xf32> to vector<8x128xf32>
    %cst_141 = arith.constant dense<0.000000e+00> : vector<8x128xf32>
    %412 = tpu.matmul %404, %229, %cst_141 {dimension_numbers = #tpu.dot_dimension_numbers<[1], [0], [0], [1], [0, 0, 1, 1], [], []>} : vector<8x32xf32>, vector<32x128xf32>, vector<8x128xf32> -> vector<8x128xf32>
    %413 = arith.addf %411, %412 : vector<8x128xf32>
    %414 = vector.extract_strided_slice %413 {offsets = [0, 0], sizes = [8, 96], strides = [1, 1]} : vector<8x128xf32> to vector<8x96xf32>
    %415 = arith.negf %414 : vector<8x96xf32>
    %416 = math.exp %415 : vector<8x96xf32>
    %cst_142 = arith.constant 1.000000e+00 : f32
    %417 = vector.broadcast %cst_142 : f32 to vector<8x96xf32>
    %418 = arith.addf %417, %416 : vector<8x96xf32>
    %419 = arith.divf %417, %418 : vector<8x96xf32>
    %420 = vector.extract_strided_slice %419 {offsets = [0, 0], sizes = [8, 32], strides = [1, 1]} : vector<8x96xf32> to vector<8x32xf32>
    %421 = vector.extract_strided_slice %419 {offsets = [0, 32], sizes = [8, 32], strides = [1, 1]} : vector<8x96xf32> to vector<8x32xf32>
    %422 = vector.extract_strided_slice %419 {offsets = [0, 64], sizes = [8, 32], strides = [1, 1]} : vector<8x96xf32> to vector<8x32xf32>
    %423 = vector.extract_strided_slice %413 {offsets = [0, 96], sizes = [8, 32], strides = [1, 1]} : vector<8x128xf32> to vector<8x32xf32>
    %424 = math.tanh %423 : vector<8x32xf32>
    %425 = arith.mulf %421, %402 : vector<8x32xf32>
    %426 = arith.mulf %420, %424 : vector<8x32xf32>
    %427 = arith.addf %425, %426 : vector<8x32xf32>
    %428 = math.tanh %427 : vector<8x32xf32>
    %429 = arith.mulf %422, %428 : vector<8x32xf32>
    %430 = arith.index_cast %c7_i32_138 : i32 to index
    %c0_143 = arith.constant 0 : index
    %c0_144 = arith.constant 0 : index
    %431 = vector.load %arg17[%430, %c0_143, %c0_144] : memref<8x8x32xf32, #tpu.memory_space<vmem>>, vector<1x8x32xf32>
    %432 = vector.shape_cast %431 : vector<1x8x32xf32> to vector<8x32xf32>
    %433 = vector.shape_cast %429 : vector<8x32xf32> to vector<1x8x32xf32>
    tpu.vector_store %arg17[%430, %c0_143, %c0_144], %433 {strides = array<i32>} : memref<8x8x32xf32, #tpu.memory_space<vmem>>, vector<1x8x32xf32>,
    %c8_i32_145 = arith.constant 8 : i32
    %c1_146 = arith.constant 1 : index
    %c0_147 = arith.constant 0 : index
    %c0_148 = arith.constant 0 : index
    %434 = vector.load %arg14[%c1_146, %c0_147, %c0_148] : memref<2x8x32xf32, #tpu.memory_space<vmem>>, vector<1x8x32xf32>
    %435 = vector.shape_cast %434 : vector<1x8x32xf32> to vector<8x32xf32>
    %436 = vector.shape_cast %429 : vector<8x32xf32> to vector<1x8x32xf32>
    tpu.vector_store %arg14[%c1_146, %c0_147, %c0_148], %436 {strides = array<i32>} : memref<2x8x32xf32, #tpu.memory_space<vmem>>, vector<1x8x32xf32>,
    %c1_149 = arith.constant 1 : index
    %c0_150 = arith.constant 0 : index
    %c0_151 = arith.constant 0 : index
    %437 = vector.load %arg15[%c1_149, %c0_150, %c0_151] : memref<2x8x32xf32, #tpu.memory_space<vmem>>, vector<1x8x32xf32>
    %438 = vector.shape_cast %437 : vector<1x8x32xf32> to vector<8x32xf32>
    %439 = vector.shape_cast %427 : vector<8x32xf32> to vector<1x8x32xf32>
    tpu.vector_store %arg15[%c1_149, %c0_150, %c0_151], %439 {strides = array<i32>} : memref<2x8x32xf32, #tpu.memory_space<vmem>>, vector<1x8x32xf32>,
    %c0_152 = arith.constant 0 : index
    %c0_153 = arith.constant 0 : index
    %c0_154 = arith.constant 0 : index
    %440 = vector.load %arg17[%c0_152, %c0_153, %c0_154] : memref<8x8x32xf32, #tpu.memory_space<vmem>>, vector<8x8x32xf32>
    %441 = vector.shape_cast %440 : vector<8x8x32xf32> to vector<64x32xf32>
    %c0_155 = arith.constant 0 : index
    %c0_156 = arith.constant 0 : index
    %442 = vector.load %arg9[%c0_155, %c0_156] : memref<32x32xf32, #tpu.memory_space<vmem>>, vector<32x32xf32>
    %cst_157 = arith.constant dense<0.000000e+00> : vector<64x32xf32>
    %443 = tpu.matmul %441, %442, %cst_157 {dimension_numbers = #tpu.dot_dimension_numbers<[1], [0], [0], [1], [0, 0, 1, 1], [], []>} : vector<64x32xf32>, vector<32x32xf32>, vector<64x32xf32> -> vector<64x32xf32>
    %c0_158 = arith.constant 0 : index
    %c0_159 = arith.constant 0 : index
    %444 = vector.load %arg10[%c0_158, %c0_159] : memref<1x32xf32, #tpu.memory_space<vmem>>, vector<1x32xf32>
    %445 = vector.broadcast %444 : vector<1x32xf32> to vector<64x32xf32>
    %446 = arith.addf %443, %445 : vector<64x32xf32>
    %cst_160 = arith.constant 5.000000e-01 : f32
    %447 = vector.broadcast %cst_160 : f32 to vector<64x32xf32>
    %448 = arith.mulf %447, %446 : vector<64x32xf32>
    %cst_161 = arith.constant 0.707106769 : f32
    %449 = vector.broadcast %cst_161 : f32 to vector<64x32xf32>
    %450 = arith.mulf %446, %449 : vector<64x32xf32>
    %cst_162 = arith.constant 0.000000e+00 : f32
    %451 = vector.broadcast %cst_162 : f32 to vector<64x32xf32>
    %452 = arith.cmpf oge, %450, %451 : vector<64x32xf32>
    %cst_163 = arith.constant 1.000000e+00 : f32
    %cst_164 = arith.constant -1.000000e+00 : f32
    %453 = vector.broadcast %cst_163 : f32 to vector<64x32xf32>
    %454 = vector.broadcast %cst_164 : f32 to vector<64x32xf32>
    %455 = arith.select %452, %453, %454 : vector<64x32xi1>, vector<64x32xf32>
    %456 = math.absf %450 : vector<64x32xf32>
    %cst_165 = arith.constant 0.327591091 : f32
    %457 = vector.broadcast %cst_165 : f32 to vector<64x32xf32>
    %458 = arith.mulf %457, %456 : vector<64x32xf32>
    %cst_166 = arith.constant 1.000000e+00 : f32
    %459 = vector.broadcast %cst_166 : f32 to vector<64x32xf32>
    %460 = arith.addf %459, %458 : vector<64x32xf32>
    %cst_167 = arith.constant 1.000000e+00 : f32
    %461 = vector.broadcast %cst_167 : f32 to vector<64x32xf32>
    %462 = arith.divf %461, %460 : vector<64x32xf32>
    %cst_168 = arith.constant 1.06140542 : f32
    %463 = vector.broadcast %cst_168 : f32 to vector<64x32xf32>
    %464 = arith.mulf %463, %462 : vector<64x32xf32>
    %cst_169 = arith.constant -1.45315206 : f32
    %465 = vector.broadcast %cst_169 : f32 to vector<64x32xf32>
    %466 = arith.addf %464, %465 : vector<64x32xf32>
    %467 = arith.mulf %466, %462 : vector<64x32xf32>
    %cst_170 = arith.constant 1.42141378 : f32
    %468 = vector.broadcast %cst_170 : f32 to vector<64x32xf32>
    %469 = arith.addf %467, %468 : vector<64x32xf32>
    %470 = arith.mulf %469, %462 : vector<64x32xf32>
    %cst_171 = arith.constant -0.284496725 : f32
    %471 = vector.broadcast %cst_171 : f32 to vector<64x32xf32>
    %472 = arith.addf %470, %471 : vector<64x32xf32>
    %473 = arith.mulf %472, %462 : vector<64x32xf32>
    %cst_172 = arith.constant 0.254829586 : f32
    %474 = vector.broadcast %cst_172 : f32 to vector<64x32xf32>
    %475 = arith.addf %473, %474 : vector<64x32xf32>
    %476 = arith.mulf %475, %462 : vector<64x32xf32>
    %cst_173 = arith.constant 0.000000e+00 : f32
    %477 = vector.broadcast %cst_173 : f32 to vector<64x32xf32>
    %478 = arith.subf %477, %456 : vector<64x32xf32>
    %479 = arith.mulf %478, %456 : vector<64x32xf32>
    %480 = math.exp %479 : vector<64x32xf32>
    %481 = arith.mulf %476, %480 : vector<64x32xf32>
    %cst_174 = arith.constant 1.000000e+00 : f32
    %482 = vector.broadcast %cst_174 : f32 to vector<64x32xf32>
    %483 = arith.subf %482, %481 : vector<64x32xf32>
    %484 = arith.mulf %455, %483 : vector<64x32xf32>
    %cst_175 = arith.constant 1.000000e+00 : f32
    %485 = vector.broadcast %cst_175 : f32 to vector<64x32xf32>
    %486 = arith.addf %485, %484 : vector<64x32xf32>
    %487 = arith.mulf %448, %486 : vector<64x32xf32>
    %c0_176 = arith.constant 0 : index
    %c0_177 = arith.constant 0 : index
    %488 = vector.load %arg11[%c0_176, %c0_177] : memref<32x16xf32, #tpu.memory_space<vmem>>, vector<32x16xf32>
    %cst_178 = arith.constant dense<0.000000e+00> : vector<64x16xf32>
    %489 = tpu.matmul %487, %488, %cst_178 {dimension_numbers = #tpu.dot_dimension_numbers<[1], [0], [0], [1], [0, 0, 1, 1], [], []>} : vector<64x32xf32>, vector<32x16xf32>, vector<64x16xf32> -> vector<64x16xf32>
    %c0_179 = arith.constant 0 : index
    %c0_180 = arith.constant 0 : index
    %490 = vector.load %arg12[%c0_179, %c0_180] : memref<1x16xf32, #tpu.memory_space<vmem>>, vector<1x16xf32>
    %491 = vector.broadcast %490 : vector<1x16xf32> to vector<64x16xf32>
    %492 = arith.addf %489, %491 : vector<64x16xf32>
    %c0_181 = arith.constant 0 : index
    %c0_182 = arith.constant 0 : index
    %493 = vector.load %arg13[%c0_181, %c0_182] : memref<64x16xf32, #tpu.memory_space<vmem>>, vector<64x16xf32>
    tpu.vector_store %arg13[%c0_181, %c0_182], %492 {strides = array<i32>} : memref<64x16xf32, #tpu.memory_space<vmem>>, vector<64x16xf32>,
    return
  }
}

</mosaic_0001>

<bundles_post_ra>
// kernel: rnn_forward.1
= control target key start
LH: loop header
LB: loop body
LE: loop exit
PB: predicated region body
PF: predicated region fallthrough
CT: control target
= control target key end

     0   :  { %21 = vsyncpa [#allocation5], 0  ;;  %vm67_vm0 = vcmask 195584   ;;  %v3405_v4 = vmov 0.0|0.0   ;;  %vm3406_vm1 = vmmov 0   ;;  %v3407_v11 = vmov 0.0   ;;  %s4114_s0 = inlined_call_operand.vmem [shape: f32[8,8,24], index: 0, kind: input, shape index: {}]   ;;  %s4115_s1 = inlined_call_operand.vmem [shape: f32[2,8,32], index: 1, kind: input, shape index: {}]   ;;  %s4116_s2 = inlined_call_operand.vmem [shape: f32[2,8,32], index: 2, kind: input, shape index: {}]   ;;  %s4117_s3 = inlined_call_operand.vmem [shape: f32[24,128], index: 3, kind: input, shape index: {}]   ;;  %s4118_s4 = inlined_call_operand.vmem [shape: f32[32,128], index: 4, kind: input, shape index: {}]   ;;  %s4119_s5 = inlined_call_operand.vmem [shape: f32[32,128], index: 5, kind: input, shape index: {}]   ;;  %s4120_s6 = inlined_call_operand.vmem [shape: f32[32,128], index: 6, kind: input, shape index: {}]   ;;  %s4121_s7 = inlined_call_operand.vmem [shape: f32[1,128], index: 7, kind: input, shape index: {}]   ;;  %s4122_s8 = inlined_call_operand.vmem [shape: f32[1,128], index: 8, kind: input, shape index: {}]   ;;  %s4123_s9 = inlined_call_operand.vmem [shape: f32[32,32], index: 9, kind: input, shape index: {}]   ;;  %s4124_s10 = inlined_call_operand.vmem [shape: f32[1,32], index: 10, kind: input, shape index: {}]   ;;  %s4125_s11 = inlined_call_operand.vmem [shape: f32[32,16], index: 11, kind: input, shape index: {}]   ;;  %s4126_s12 = inlined_call_operand.vmem [shape: f32[1,16], index: 12, kind: input, shape index: {}]   ;;  %s4127_s13 = inlined_call_operand.vmem [shape: f32[64,16], index: 13, kind: output, shape index: {0}]   ;;  %s4128_s14 = inlined_call_operand.hbm [shape: f32[2,8,32], index: 14, kind: output, shape index: {1}]   ;;  %s4129_s15 = inlined_call_operand.hbm [shape: f32[2,8,32], index: 15, kind: output, shape index: {2}]  }
   0x1   :  { %v57_v0 = vld [vmem:[%s4117_s3] sm:$0xff]  ;;  %v58_v1 = vld [vmem:[%s4117_s3 + $0x8] sm:$0xff]  ;;  %3066 = vmatprep.subr.bf16.mxu1 %v3405_v4  ;;  %v59_v8 = vld [vmem:[%s4117_s3 + $0x10] sm:$0xff]  ;;  %2834 = vmatprep.mubr.msk.f32.mxu1 %vm3406_vm1, %v3407_v11 }
   0x2   :  { %v205_v2 = vld [vmem:[%s4119_s5] sm:$0xff]  ;;  %v3062_v3 = vpack.c.bf16 %v58_v1, %v57_v0  ;;  %v206_v5 = vld [vmem:[%s4119_s5 + $0x8] sm:$0xff]  ;;  %v207_v9 = vld [vmem:[%s4119_s5 + $0x10] sm:$0xff] }
   0x3   :  { %v49_v6 = vld [vmem:[%s4114_s0] sm:$0xff]  ;;  %v3512_v7 = vpack.c.bf16 %v206_v5, %v205_v2  ;;  %v208_v10 = vld [vmem:[%s4119_s5 + $0x18] sm:$0xff] }
   0x4   :  { %2814 = vmatprep.mubr.msk.f32.mxu0 %vm67_vm0, %v49_v6  ;;  %3063 = vmatprep.subr.bf16.mxu0 %v3062_v3 }
   0x5   :  { %22 = vsyncpa [#allocation7], 0  ;;  %3065 = vmatpush3.bf16.msra.mxu0 %v3062_v3  ;;  %3068 = vmatpush3.bf16.msra.mxu1 %v3512_v7  ;;  %v3527_v12 = vpack.c.bf16 %v208_v10, %v207_v9  ;;  %v50_v13 = vld [vmem:[%s4114_s0 + $0x8] sm:$0xff]  ;;  %v209_v14 = vld [vmem:[%s4115_s1] sm:$0xff]  ;;  %vm212_vm2 = vcmask 261120   ;;  %s3408_s23 = smov 32  }
   0x6   :  { %2812 = vmatprep.subr.mxu0 %v59_v8  ;;  %3069 = vmatprep.subr.bf16.mxu1 %v3405_v4  ;;  %v3554_v15 = vld [vmem:[%s4121_s7] ss:$0 sm:$0xff]  ;;  %s3409_s7 = smov 64   ;;  %v51_v52 = vld [vmem:[%s4114_s0 + $0x10] sm:$0xff]  ;;  %v52_v53 = vld [vmem:[%s4114_s0 + $0x18] sm:$0xff]  ;;  %vm2566_vm9 = vcmask 130048  }
   0x7   :  { %v210_v23 = vld [vmem:[%s4116_s2] sm:$0xff]  ;;  %v54_v55 = vld [vmem:[%s4114_s0 + $0x28] sm:$0xff]  ;;  %v55_v56 = vld [vmem:[%s4114_s0 + $0x30] sm:$0xff]  ;;  %s3411_s27 = smov 96  }
   0x8   :  { %v53_v54 = vld [vmem:[%s4114_s0 + $0x20] sm:$0xff]  ;;  %v56_v57 = vld [vmem:[%s4114_s0 + $0x38] sm:$0xff] }
   0x9   :  { %2813 = vmatpush3.msra.mxu0 %v59_v8  ;;  %3071 = vmatpush3.bf16.msra.mxu1 %v3527_v12 }
   0xa   :  { %2815 = vmatmul.mubr.msk.f32.vlgmr.msra.gmra.mrb[0].mxu0 %vm67_vm0, %v50_v13  ;;  %3072 = vmatprep.subr.bf16.mxu1 %v3405_v4 }
   0xb   :  { %3078 = vmatprep.subr.bf16.mxu0 %v3405_v4  ;;  %2817 = vmatprep.mubr.msk.f32.mxu0 %vm67_vm0, %v51_v52 }
   0xc   :  { %2835 = vmatmul.mubr.msk.f32.vlgmr.msra.gmra.mrb[0].mxu1 %vm212_vm2, %v209_v14  ;;  %3080 = vmatpush3.bf16.msra.mxu0 %v3512_v7 }
   0xd   :  { %3074 = vmatpush3.bf16.msra.mxu1 %v3512_v7  ;;  %2845 = vmatprep.mubr.msk.f32.mxu1 %vm3406_vm1, %v3407_v11 }
   0xe   :  { %3075 = vmatprep.subr.bf16.mxu1 %v3405_v4  ;;  %3081 = vmatprep.subr.bf16.mxu0 %v3405_v4 }
   0xf   :  { %2818 = vmatmul.mubr.msk.f32.gmra.mrb[2].mxu0 %vm67_vm0, %v52_v53 }
  0x10   :  { %3083 = vmatpush3.bf16.msra.mxu0 %v3527_v12  ;;  %2820 = vmatprep.mubr.msk.f32.mxu0 %vm67_vm0, %v53_v54 }
  0x11   :  { %3077 = vmatpush3.bf16.msra.mxu1 %v3527_v12  ;;  %3090 = vmatprep.subr.bf16.mxu0 %v3405_v4 }
  0x12   :  { %3084 = vmatprep.subr.bf16.mxu1 %v3405_v4 }
  0x13   :  { %2821 = vmatmul.mubr.msk.f32.gmra.mrb[4].mxu0 %vm67_vm0, %v54_v55 }
  0x14   :  { %2823 = vmatprep.mubr.msk.f32.mxu0 %vm67_vm0, %v55_v56 }
  0x17   :  { %2824 = vmatmul.mubr.msk.f32.gmra.mrb[6].mxu0 %vm67_vm0, %v56_v57 }
  0x18   :  { %2856 = vmatprep.mubr.msk.f32.mxu0 %vm3406_vm1, %v3407_v11 }
  0xdd   :  { %v2816_v16 = vpop.f32.mrb[0].mxu0 }
  0xde   :  { %v158_v17 = vpop.f32.mrb[1].mxu0  ;;  %v164_v38 = vadd.f32 %v2816_v16, %v3554_v15 }
  0xdf   :  { %v159_v18 = vadd.f32 %v3554_v15, %v158_v17  ;;  %v282_v19 = vpop.f32.mrb[0].mxu1 }
  0xe0   :  { %v2836_v20 = vpop.f32.mrb[1].mxu1 }
  0xe1   :  { %v286_v21 = vadd.f32 %v282_v19, %v159_v18 }
  0xe2   :  { %v2819_v61 = vpop.f32.mrb[2].mxu0 }
  0xe3   :  { %3197 = vtanh.f32 %v286_v21  ;;  %v2621_v24 = vmul.f32 -1.442695, %v286_v21  ;;  %v168_v62 = vpop.f32.mrb[3].mxu0 }
  0xe4   :  { %v169_v5 = vadd.f32 %v3554_v15, %v168_v62 }
  0xe5   :  { %3199 = vpow2.f32 %v2621_v24 }
  0xe6   :  { %v3604_v63 = vpop.f32.mrb[4].mxu0 }
  0xe7   :  { %v3606_v0 = vpop.f32.mrb[5].mxu0 }
  0xea   :  { %v3608_v1 = vpop.f32.mrb[6].mxu0 }
  0xeb   :  { %v3610_v2 = vpop.f32.mrb[7].mxu0 }
  0xed   :  { %v3198_v22 = vpop.eup %3197 }
  0xee   :  { %300 = vrot.lane.b32.xlu0 %v3198_v22, %s3408_s23 }
  0xef   :  { %v3200_v25 = vpop.eup %3199 }
  0xf0   :  { %v290_v26 = vadd.f32 1.0, %v3200_v25 }
  0xf2   :  { %295 = vrot.lane.b32.xlu0 %v210_v23, %s3408_s23  ;;  %3201 = vrcp.f32 %v290_v26 }
  0xfc   :  { %v3202_v27 = vpop.eup %3201 }
 0x160   :  { %v301_v28 = vpop.permute.xlu0 %300 }
 0x161   :  { %v303_v29 = vmul.f32 %v3202_v27, %v301_v28 }
 0x163   :  { %305 = vrot.lane.b32.xlu1 %v303_v29, %s3408_s23 }
 0x164   :  { %v296_v30 = vpop.permute.xlu0 %295 }
 0x165   :  { %v298_v31 = vmul.f32 %v3202_v27, %v296_v30 }
 0x1d5   :  { %v306_v32 = vpop.permute.xlu1 %305 }
 0x1d6   :  { %v308_v33 = vadd.f32 %v306_v32, %v298_v31 }
 0x1d8   :  { %3203 = vtanh.f32 %v308_v33 }
 0x1e2   :  { %v3204_v34 = vpop.eup %3203 }
 0x1e3   :  { %311 = vrot.lane.b32.xlu1 %v3204_v34, %s3408_s23 }
 0x255   :  { %v312_v35 = vpop.permute.xlu1 %311 }
 0x256   :  { %v314_v36 = vmul.f32 %v3202_v27, %v312_v35  ;;  %v174_v27 = vadd.f32 %v2819_v61, %v3554_v15 }
 0x258   :  { %316 = vrot.lane.b32.xlu0 %v314_v36, %s3409_s7 }
 0x2ca   :  { %v317_v37 = vpop.permute.xlu0 %316 }
 0x2cb   :  { %319 = vst.msk [vmem:[#allocation3] sm:$0xff] %vm212_vm2, %v317_v37  ;;  %2846 = vmatmul.mubr.msk.f32.vlgmr.msra.gmra.mrb[2].mxu1 %vm212_vm2, %v317_v37 }
 0x2cc   :  { %3086 = vmatpush3.bf16.msra.mxu1 %v3512_v7  ;;  %2867 = vmatprep.mubr.msk.f32.mxu1 %vm3406_vm1, %v3407_v11 }
 0x2cd   :  { %3087 = vmatprep.subr.bf16.mxu1 %v3405_v4 }
 0x2d0   :  { %3089 = vmatpush3.bf16.msra.mxu1 %v3527_v12 }
 0x2d1   :  { %3096 = vmatprep.subr.bf16.mxu1 %v3405_v4 }
 0x39e   :  { %v390_v39 = vpop.f32.mrb[2].mxu1 }
 0x39f   :  { %v394_v40 = vadd.f32 %v390_v39, %v164_v38  ;;  %v2847_v41 = vpop.f32.mrb[3].mxu1 }
 0x3a1   :  { %3205 = vtanh.f32 %v394_v40  ;;  %v2623_v43 = vmul.f32 -1.442695, %v394_v40 }
 0x3a3   :  { %3207 = vpow2.f32 %v2623_v43 }
 0x3ab   :  { %v3206_v42 = vpop.eup %3205 }
 0x3ac   :  { %404 = vrot.lane.b32.xlu1 %v3206_v42, %s3408_s23 }
 0x3ad   :  { %v3208_v44 = vpop.eup %3207 }
 0x3ae   :  { %v398_v45 = vadd.f32 1.0, %v3208_v44 }
 0x3b0   :  { %3209 = vrcp.f32 %v398_v45  ;;  %v179_v45 = vadd.f32 %v3554_v15, %v3606_v0  ;;  %v184_v0 = vadd.f32 %v3604_v63, %v3554_v15 }
 0x3ba   :  { %v3210_v46 = vpop.eup %3209 }
 0x3bb   :  { %v402_v49 = vmul.f32 %v3210_v46, %v308_v33 }
 0x41e   :  { %v405_v47 = vpop.permute.xlu1 %404 }
 0x41f   :  { %v407_v48 = vmul.f32 %v3210_v46, %v405_v47 }
 0x421   :  { %409 = vrot.lane.b32.xlu0 %v407_v48, %s3408_s23 }
 0x493   :  { %v410_v50 = vpop.permute.xlu0 %409 }
 0x494   :  { %v412_v51 = vadd.f32 %v410_v50, %v402_v49 }
 0x496   :  { %3211 = vtanh.f32 %v412_v51 }
 0x4a0   :  { %v3212_v58 = vpop.eup %3211 }
 0x4a1   :  { %415 = vrot.lane.b32.xlu1 %v3212_v58, %s3408_s23 }
 0x513   :  { %v416_v59 = vpop.permute.xlu1 %415 }
 0x514   :  { %v418_v60 = vmul.f32 %v3210_v46, %v416_v59 }
 0x516   :  { %420 = vrot.lane.b32.xlu0 %v418_v60, %s3409_s7 }
 0x588   :  { %v421_v3 = vpop.permute.xlu0 %420 }
 0x589   :  { %424 = vst.msk [vmem:[#allocation3 + $0x8] sm:$0xff] %vm212_vm2, %v421_v3  ;;  %2857 = vmatmul.mubr.msk.f32.vlgmr.msra.gmra.mrb[8].mxu0 %vm212_vm2, %v421_v3 }
 0x58a   :  { %3092 = vmatpush3.bf16.msra.mxu0 %v3512_v7  ;;  %2878 = vmatprep.mubr.msk.f32.mxu0 %vm3406_vm1, %v3407_v11 }
 0x58b   :  { %3093 = vmatprep.subr.bf16.mxu0 %v3405_v4 }
 0x58e   :  { %3095 = vmatpush3.bf16.msra.mxu0 %v3527_v12 }
 0x58f   :  { %3102 = vmatprep.subr.bf16.mxu0 %v3405_v4 }
 0x65c   :  { %v495_v6 = vpop.f32.mrb[8].mxu0 }
 0x65d   :  { %v499_v8 = vadd.f32 %v495_v6, %v169_v5  ;;  %v2858_v9 = vpop.f32.mrb[9].mxu0 }
 0x65f   :  { %3213 = vtanh.f32 %v499_v8  ;;  %v2625_v13 = vmul.f32 -1.442695, %v499_v8 }
 0x661   :  { %3215 = vpow2.f32 %v2625_v13 }
 0x669   :  { %v3214_v10 = vpop.eup %3213 }
 0x66a   :  { %509 = vrot.lane.b32.xlu1 %v3214_v10, %s3408_s23 }
 0x66b   :  { %v3216_v14 = vpop.eup %3215 }
 0x66c   :  { %v503_v16 = vadd.f32 1.0, %v3216_v14 }
 0x66e   :  { %3217 = vrcp.f32 %v503_v16 }
 0x678   :  { %v3218_v17 = vpop.eup %3217 }
 0x679   :  { %v507_v20 = vmul.f32 %v3218_v17, %v412_v51 }
 0x6dc   :  { %v510_v18 = vpop.permute.xlu1 %509 }
 0x6dd   :  { %v512_v19 = vmul.f32 %v3218_v17, %v510_v18  ;;  %v1069_v18 = vld [vmem:[%s4118_s4] sm:$0xff] }
 0x6df   :  { %514 = vrot.lane.b32.xlu0 %v512_v19, %s3408_s23  ;;  %v1070_v19 = vld [vmem:[%s4118_s4 + $0x8] sm:$0xff] }
 0x751   :  { %v515_v21 = vpop.permute.xlu0 %514 }
 0x752   :  { %v517_v22 = vadd.f32 %v515_v21, %v507_v20  ;;  %v3114_v20 = vpack.c.bf16 %v1070_v19, %v1069_v18 }
 0x754   :  { %3219 = vtanh.f32 %v517_v22 }
 0x75e   :  { %v3220_v23 = vpop.eup %3219 }
 0x75f   :  { %520 = vrot.lane.b32.xlu1 %v3220_v23, %s3408_s23 }
 0x7d1   :  { %v521_v24 = vpop.permute.xlu1 %520 }
 0x7d2   :  { %v523_v25 = vmul.f32 %v3218_v17, %v521_v24  ;;  %v1071_v24 = vld [vmem:[%s4118_s4 + $0x10] sm:$0xff] }
 0x7d4   :  { %525 = vrot.lane.b32.xlu0 %v523_v25, %s3409_s7  ;;  %v1072_v25 = vld [vmem:[%s4118_s4 + $0x18] sm:$0xff] }
 0x846   :  { %v526_v26 = vpop.permute.xlu0 %525 }
 0x847   :  { %529 = vst.msk [vmem:[#allocation3 + $0x10] sm:$0xff] %vm212_vm2, %v526_v26  ;;  %2868 = vmatmul.mubr.msk.f32.vlgmr.msra.gmra.mrb[4].mxu1 %vm212_vm2, %v526_v26  ;;  %v3118_v26 = vpack.c.bf16 %v1072_v25, %v1071_v24 }
 0x848   :  { %3098 = vmatpush3.bf16.msra.mxu1 %v3512_v7  ;;  %2889 = vmatprep.mubr.msk.f32.mxu1 %vm3406_vm1, %v3407_v11 }
 0x849   :  { %3099 = vmatprep.subr.bf16.mxu1 %v3405_v4 }
 0x84c   :  { %3101 = vmatpush3.bf16.msra.mxu1 %v3527_v12 }
 0x84d   :  { %3108 = vmatprep.subr.bf16.mxu1 %v3405_v4 }
 0x91a   :  { %v600_v28 = vpop.f32.mrb[4].mxu1 }
 0x91b   :  { %v604_v29 = vadd.f32 %v600_v28, %v174_v27  ;;  %v2869_v30 = vpop.f32.mrb[5].mxu1  ;;  %v1061_v28 = vld [vmem:[#allocation3] sm:$0xff] }
 0x91c   :  { %v1063_v30 = vld [vmem:[#allocation3 + $0x10] sm:$0xff] }
 0x91d   :  { %3221 = vtanh.f32 %v604_v29  ;;  %v2627_v32 = vmul.f32 -1.442695, %v604_v29  ;;  %v1062_v29 = vld [vmem:[#allocation3 + $0x8] sm:$0xff] }
 0x91f   :  { %3223 = vpow2.f32 %v2627_v32 }
 0x927   :  { %v3222_v31 = vpop.eup %3221 }
 0x928   :  { %614 = vrot.lane.b32.xlu1 %v3222_v31, %s3408_s23 }
 0x929   :  { %v3224_v33 = vpop.eup %3223 }
 0x92a   :  { %v608_v34 = vadd.f32 1.0, %v3224_v33 }
 0x92c   :  { %3225 = vrcp.f32 %v608_v34  ;;  %v189_v34 = vadd.f32 %v3554_v15, %v3610_v2 }
 0x936   :  { %v3226_v35 = vpop.eup %3225 }
 0x937   :  { %v612_v38 = vmul.f32 %v3226_v35, %v517_v22 }
 0x99a   :  { %v615_v36 = vpop.permute.xlu1 %614 }
 0x99b   :  { %v617_v37 = vmul.f32 %v3226_v35, %v615_v36 }
 0x99d   :  { %619 = vrot.lane.b32.xlu0 %v617_v37, %s3408_s23 }
 0xa0f   :  { %v620_v39 = vpop.permute.xlu0 %619 }
 0xa10   :  { %v622_v40 = vadd.f32 %v620_v39, %v612_v38 }
 0xa12   :  { %3227 = vtanh.f32 %v622_v40 }
 0xa1c   :  { %v3228_v41 = vpop.eup %3227 }
 0xa1d   :  { %625 = vrot.lane.b32.xlu1 %v3228_v41, %s3408_s23 }
 0xa8f   :  { %v626_v42 = vpop.permute.xlu1 %625 }
 0xa90   :  { %v628_v43 = vmul.f32 %v3226_v35, %v626_v42 }
 0xa92   :  { %630 = vrot.lane.b32.xlu0 %v628_v43, %s3409_s7 }
 0xb04   :  { %v631_v44 = vpop.permute.xlu0 %630 }
 0xb05   :  { %634 = vst.msk [vmem:[#allocation3 + $0x18] sm:$0xff] %vm212_vm2, %v631_v44  ;;  %2879 = vmatmul.mubr.msk.f32.vlgmr.msra.gmra.mrb[10].mxu0 %vm212_vm2, %v631_v44 }
 0xb06   :  { %3104 = vmatpush3.bf16.msra.mxu0 %v3512_v7  ;;  %2900 = vmatprep.mubr.msk.f32.mxu0 %vm3406_vm1, %v3407_v11 }
 0xb07   :  { %3105 = vmatprep.subr.bf16.mxu0 %v3405_v4 }
 0xb0a   :  { %3107 = vmatpush3.bf16.msra.mxu0 %v3527_v12 }
 0xb0b   :  { %3115 = vmatprep.subr.bf16.mxu0 %v3114_v20 }
 0xb0c   :  { %v1064_v31 = vld [vmem:[#allocation3 + $0x18] sm:$0xff] }
 0xbd8   :  { %v705_v46 = vpop.f32.mrb[10].mxu0 }
 0xbd9   :  { %v709_v47 = vadd.f32 %v705_v46, %v179_v45  ;;  %v2880_v48 = vpop.f32.mrb[11].mxu0 }
 0xbdb   :  { %3229 = vtanh.f32 %v709_v47  ;;  %v2629_v50 = vmul.f32 -1.442695, %v709_v47 }
 0xbdd   :  { %3231 = vpow2.f32 %v2629_v50 }
 0xbe5   :  { %v3230_v49 = vpop.eup %3229 }
 0xbe6   :  { %719 = vrot.lane.b32.xlu1 %v3230_v49, %s3408_s23 }
 0xbe7   :  { %v3232_v51 = vpop.eup %3231 }
 0xbe8   :  { %v713_v52 = vadd.f32 1.0, %v3232_v51 }
 0xbea   :  { %3233 = vrcp.f32 %v713_v52 }
 0xbf4   :  { %v3234_v53 = vpop.eup %3233 }
 0xbf5   :  { %v717_v56 = vmul.f32 %v3234_v53, %v622_v40 }
 0xc58   :  { %v720_v54 = vpop.permute.xlu1 %719 }
 0xc59   :  { %v722_v55 = vmul.f32 %v3234_v53, %v720_v54  ;;  %v1217_v54 = vld [vmem:[%s4120_s6] sm:$0xff] }
 0xc5b   :  { %724 = vrot.lane.b32.xlu0 %v722_v55, %s3408_s23  ;;  %v1218_v55 = vld [vmem:[%s4120_s6 + $0x8] sm:$0xff] }
 0xccd   :  { %v725_v57 = vpop.permute.xlu0 %724 }
 0xcce   :  { %v727_v58 = vadd.f32 %v725_v57, %v717_v56  ;;  %v3710_v56 = vpack.c.bf16 %v1218_v55, %v1217_v54  ;;  %v1219_v57 = vld [vmem:[%s4120_s6 + $0x10] sm:$0xff] }
 0xcd0   :  { %3235 = vtanh.f32 %v727_v58 }
 0xcda   :  { %v3236_v59 = vpop.eup %3235 }
 0xcdb   :  { %730 = vrot.lane.b32.xlu1 %v3236_v59, %s3408_s23 }
 0xd4d   :  { %v731_v60 = vpop.permute.xlu1 %730 }
 0xd4e   :  { %v733_v61 = vmul.f32 %v3234_v53, %v731_v60 }
 0xd50   :  { %735 = vrot.lane.b32.xlu0 %v733_v61, %s3409_s7 }
 0xdc2   :  { %v736_v62 = vpop.permute.xlu0 %735 }
 0xdc3   :  { %739 = vst.msk [vmem:[#allocation3 + $0x20] sm:$0xff] %vm212_vm2, %v736_v62  ;;  %2890 = vmatmul.mubr.msk.f32.vlgmr.msra.gmra.mrb[6].mxu1 %vm212_vm2, %v736_v62  ;;  %v2646_v62 = vld [vmem:[%s4116_s2 + $0x8] sm:$0xff] }
 0xdc4   :  { %3110 = vmatpush3.bf16.msra.mxu1 %v3512_v7  ;;  %2911 = vmatprep.mubr.msk.f32.mxu1 %vm3406_vm1, %v3407_v11 }
 0xdc5   :  { %3111 = vmatprep.subr.bf16.mxu1 %v3405_v4 }
 0xdc8   :  { %3113 = vmatpush3.bf16.msra.mxu1 %v3527_v12 }
 0xdc9   :  { %3122 = vmatprep.subr.bf16.mxu1 %v3405_v4 }
 0xdca   :  { %v1065_v32 = vld [vmem:[#allocation3 + $0x20] sm:$0xff] }
 0xe96   :  { %v810_v3 = vpop.f32.mrb[6].mxu1 }
 0xe97   :  { %v814_v5 = vadd.f32 %v810_v3, %v184_v0  ;;  %v2891_v6 = vpop.f32.mrb[7].mxu1  ;;  %v2645_v3 = vld [vmem:[%s4115_s1 + $0x8] sm:$0xff] }
 0xe98   :  { %v194_v6 = vadd.f32 %v3608_v1, %v3554_v15 }
 0xe99   :  { %3237 = vtanh.f32 %v814_v5  ;;  %v2631_v7 = vmul.f32 -1.442695, %v814_v5 }
 0xe9b   :  { %3239 = vpow2.f32 %v2631_v7 }
 0xea3   :  { %v3238_v8 = vpop.eup %3237 }
 0xea4   :  { %824 = vrot.lane.b32.xlu1 %v3238_v8, %s3408_s23 }
 0xea5   :  { %v3240_v9 = vpop.eup %3239 }
 0xea6   :  { %v818_v10 = vadd.f32 1.0, %v3240_v9 }
 0xea8   :  { %3241 = vrcp.f32 %v818_v10  ;;  %v3753_v10 = vld [vmem:[%s4122_s8] ss:$0 sm:$0xff] }
 0xeb2   :  { %v3242_v13 = vpop.eup %3241 }
 0xeb3   :  { %v822_v16 = vmul.f32 %v3242_v13, %v727_v58  ;;  %v1220_v58 = vld [vmem:[%s4120_s6 + $0x18] sm:$0xff] }
 0xeb4   :  { %v3720_v59 = vpack.c.bf16 %v1220_v58, %v1219_v57 }
 0xf16   :  { %v825_v14 = vpop.permute.xlu1 %824 }
 0xf17   :  { %v827_v12 = vmul.f32 %v3242_v13, %v825_v14 }
 0xf19   :  { %829 = vrot.lane.b32.xlu0 %v827_v12, %s3408_s23 }
 0xf8b   :  { %v830_v17 = vpop.permute.xlu0 %829 }
 0xf8c   :  { %v832_v63 = vadd.f32 %v830_v17, %v822_v16 }
 0xf8e   :  { %3243 = vtanh.f32 %v832_v63 }
 0xf98   :  { %v3244_v21 = vpop.eup %3243 }
 0xf99   :  { %835 = vrot.lane.b32.xlu1 %v3244_v21, %s3408_s23 }
0x100b   :  { %v836_v22 = vpop.permute.xlu1 %835 }
0x100c   :  { %v838_v23 = vmul.f32 %v3242_v13, %v836_v22 }
0x100e   :  { %840 = vrot.lane.b32.xlu0 %v838_v23, %s3409_s7 }
0x1080   :  { %v841_v27 = vpop.permute.xlu0 %840 }
0x1081   :  { %844 = vst.msk [vmem:[#allocation3 + $0x28] sm:$0xff] %vm212_vm2, %v841_v27  ;;  %2901 = vmatmul.mubr.msk.f32.vlgmr.msra.gmra.mrb[12].mxu0 %vm212_vm2, %v841_v27 }
0x1082   :  { %3117 = vmatpush3.bf16.msra.mxu0 %v3114_v20  ;;  %2922 = vmatprep.mubr.msk.f32.mxu0 %vm212_vm2, %v1061_v28 }
0x1083   :  { %3119 = vmatprep.subr.bf16.mxu0 %v3118_v26 }
0x1086   :  { %3121 = vmatpush3.bf16.msra.mxu0 %v3118_v26 }
0x1087   :  { %3134 = vmatprep.subr.bf16.mxu0 %v3405_v4 }
0x1088   :  { %v1066_v33 = vld [vmem:[#allocation3 + $0x28] sm:$0xff] }
0x1089   :  { %2923 = vmatmul.mubr.msk.f32.vlgmr.msra.gmra.mrb[14].mxu0 %vm212_vm2, %v1062_v29 }
0x108a   :  { %2925 = vmatprep.mubr.msk.f32.mxu0 %vm212_vm2, %v1063_v30  ;;  %3136 = vmatpush3.bf16.msra.mxu0 %v3710_v56 }
0x108b   :  { %3137 = vmatprep.subr.bf16.mxu0 %v3405_v4 }
0x108d   :  { %2926 = vmatmul.mubr.msk.f32.gmra.mrb[16].mxu0 %vm212_vm2, %v1064_v31 }
0x108e   :  { %2928 = vmatprep.mubr.msk.f32.mxu0 %vm212_vm2, %v1065_v32  ;;  %3139 = vmatpush3.bf16.msra.mxu0 %v3720_v59 }
0x108f   :  { %3146 = vmatprep.subr.bf16.mxu0 %v3405_v4 }
0x1091   :  { %2929 = vmatmul.mubr.msk.f32.gmra.mrb[18].mxu0 %vm212_vm2, %v1066_v33 }
0x1154   :  { %v915_v35 = vpop.f32.mrb[12].mxu0 }
0x1155   :  { %v919_v36 = vadd.f32 %v915_v35, %v189_v34  ;;  %v2902_v37 = vpop.f32.mrb[13].mxu0 }
0x1157   :  { %3245 = vtanh.f32 %v919_v36  ;;  %v2633_v45 = vmul.f32 -1.442695, %v919_v36 }
0x1159   :  { %3247 = vpow2.f32 %v2633_v45 }
0x115c   :  { %v3688_v38 = vpop.f32.mrb[14].mxu0 }
0x115d   :  { %v1170_v39 = vpop.f32.mrb[15].mxu0 }
0x115e   :  { %v1171_v13 = vadd.f32 %v3753_v10, %v1170_v39 }
0x1160   :  { %v3690_v40 = vpop.f32.mrb[16].mxu0 }
0x1161   :  { %v3246_v41 = vpop.eup %3245  ;;  %v3692_v42 = vpop.f32.mrb[17].mxu0 }
0x1162   :  { %929 = vrot.lane.b32.xlu1 %v3246_v41, %s3408_s23 }
0x1163   :  { %v3248_v2 = vpop.eup %3247 }
0x1164   :  { %v3695_v43 = vpop.f32.mrb[18].mxu0  ;;  %v923_v46 = vadd.f32 1.0, %v3248_v2 }
0x1165   :  { %v3697_v44 = vpop.f32.mrb[19].mxu0 }
0x1166   :  { %3249 = vrcp.f32 %v923_v46  ;;  %v1176_v46 = vadd.f32 %v3688_v38, %v3753_v10 }
0x1170   :  { %v3250_v47 = vpop.eup %3249 }
0x1171   :  { %v927_v50 = vmul.f32 %v3250_v47, %v832_v63 }
0x11d4   :  { %v930_v48 = vpop.permute.xlu1 %929 }
0x11d5   :  { %v932_v49 = vmul.f32 %v3250_v47, %v930_v48 }
0x11d7   :  { %934 = vrot.lane.b32.xlu0 %v932_v49, %s3408_s23 }
0x1249   :  { %v935_v51 = vpop.permute.xlu0 %934 }
0x124a   :  { %v3700_v52 = vadd.f32 %v935_v51, %v927_v50 }
0x124c   :  { %3251 = vtanh.f32 %v3700_v52 }
0x1256   :  { %v3252_v53 = vpop.eup %3251 }
0x1257   :  { %940 = vrot.lane.b32.xlu1 %v3252_v53, %s3408_s23 }
0x12c9   :  { %v941_v60 = vpop.permute.xlu1 %940 }
0x12ca   :  { %v943_v61 = vmul.f32 %v3250_v47, %v941_v60 }
0x12cc   :  { %945 = vrot.lane.b32.xlu0 %v943_v61, %s3409_s7 }
0x12d0   :  { %1308 = vrot.lane.b32.xlu0 %v2646_v62, %s3408_s23 }
0x133e   :  { %v946_v0 = vpop.permute.xlu0 %945 }
0x133f   :  { %949 = vst.msk [vmem:[#allocation3 + $0x30] sm:$0xff] %vm212_vm2, %v946_v0  ;;  %2912 = vmatmul.mubr.msk.f32.vlgmr.msra.gmra.mrb[8].mxu1 %vm212_vm2, %v946_v0 }
0x1340   :  { %3124 = vmatpush3.bf16.msra.mxu1 %v3710_v56  ;;  %2942 = vmatprep.mubr.msk.f32.mxu1 %vm3406_vm1, %v3407_v11 }
0x1341   :  { %3125 = vmatprep.subr.bf16.mxu1 %v3405_v4 }
0x1342   :  { %v1309_v21 = vpop.permute.xlu0 %1308 }
0x1344   :  { %3127 = vmatpush3.bf16.msra.mxu1 %v3720_v59 }
0x1345   :  { %3128 = vmatprep.subr.bf16.mxu1 %v3405_v4 }
0x1346   :  { %v1067_v5 = vld [vmem:[#allocation3 + $0x30] sm:$0xff] }
0x1347   :  { %2943 = vmatmul.mubr.msk.f32.vlgmr.msra.gmra.mrb[10].mxu1 %vm212_vm2, %v2645_v3  ;;  %2931 = vmatprep.mubr.msk.f32.mxu0 %vm212_vm2, %v1067_v5 }
0x1348   :  { %3130 = vmatpush3.bf16.msra.mxu1 %v3710_v56  ;;  %2953 = vmatprep.mubr.msk.f32.mxu1 %vm3406_vm1, %v3407_v11 }
0x1349   :  { %3131 = vmatprep.subr.bf16.mxu1 %v3405_v4 }
0x134c   :  { %3133 = vmatpush3.bf16.msra.mxu1 %v3720_v59 }
0x134d   :  { %3140 = vmatprep.subr.bf16.mxu1 %v3405_v4 }
0x1412   :  { %v1020_v8 = vpop.f32.mrb[8].mxu1 }
0x1413   :  { %v1024_v7 = vadd.f32 %v1020_v8, %v194_v6  ;;  %v2913_v9 = vpop.f32.mrb[9].mxu1 }
0x1414   :  { %v1181_v9 = vadd.f32 %v3753_v10, %v3692_v42 }
0x1415   :  { %v2635_v27 = vmul.f32 -1.442695, %v1024_v7 }
0x141a   :  { %v1295_v14 = vpop.f32.mrb[10].mxu1 }
0x141b   :  { %v1299_v12 = vadd.f32 %v1295_v14, %v1171_v13  ;;  %v2944_v16 = vpop.f32.mrb[11].mxu1 }
0x141d   :  { %3253 = vtanh.f32 %v1299_v12  ;;  %v2648_v63 = vmul.f32 -1.442695, %v1299_v12 }
0x141f   :  { %3255 = vpow2.f32 %v2648_v63 }
0x1427   :  { %v3254_v17 = vpop.eup %3253 }
0x1428   :  { %1313 = vrot.lane.b32.xlu1 %v3254_v17, %s3408_s23 }
0x1429   :  { %v3256_v15 = vpop.eup %3255 }
0x142a   :  { %v1303_v1 = vadd.f32 1.0, %v3256_v15 }
0x142c   :  { %3257 = vrcp.f32 %v1303_v1 }
0x1436   :  { %v3258_v18 = vpop.eup %3257 }
0x1437   :  { %v1311_v22 = vmul.f32 %v3258_v18, %v1309_v21 }
0x149a   :  { %v1314_v19 = vpop.permute.xlu1 %1313 }
0x149b   :  { %v1316_v20 = vmul.f32 %v3258_v18, %v1314_v19 }
0x149d   :  { %1318 = vrot.lane.b32.xlu1 %v1316_v20, %s3408_s23 }
0x150f   :  { %v1319_v23 = vpop.permute.xlu1 %1318 }
0x1510   :  { %v1321_v24 = vadd.f32 %v1319_v23, %v1311_v22 }
0x1512   :  { %3259 = vtanh.f32 %v1321_v24 }
0x1513   :  { %3261 = vtanh.f32 %v1024_v7 }
0x1514   :  { %3263 = vpow2.f32 %v2635_v27 }
0x151c   :  { %v3260_v25 = vpop.eup %3259 }
0x151d   :  { %1324 = vrot.lane.b32.xlu0 %v3260_v25, %s3408_s23  ;;  %v3262_v26 = vpop.eup %3261 }
0x151e   :  { %v3264_v28 = vpop.eup %3263 }
0x151f   :  { %v1028_v29 = vadd.f32 1.0, %v3264_v28 }
0x1521   :  { %1034 = vrot.lane.b32.xlu0 %v3262_v26, %s3408_s23  ;;  %3265 = vrcp.f32 %v1028_v29  ;;  %v1186_v26 = vadd.f32 %v3690_v40, %v3753_v10 }
0x152b   :  { %v3266_v32 = vpop.eup %3265 }
0x152c   :  { %v1032_v36 = vmul.f32 %v3266_v32, %v3700_v52 }
0x158f   :  { %v1325_v30 = vpop.permute.xlu0 %1324 }
0x1590   :  { %v1327_v31 = vmul.f32 %v3258_v18, %v1325_v30 }
0x1592   :  { %1329 = vrot.lane.b32.xlu1 %v1327_v31, %s3409_s7 }
0x1593   :  { %v1035_v33 = vpop.permute.xlu0 %1034 }
0x1594   :  { %v1037_v34 = vmul.f32 %v3266_v32, %v1035_v33 }
0x1596   :  { %1039 = vrot.lane.b32.xlu0 %v1037_v34, %s3408_s23 }
0x1604   :  { %v1330_v35 = vpop.permute.xlu1 %1329 }
0x1605   :  { %1332 = vst.msk [vmem:[#allocation3] sm:$0xff] %vm212_vm2, %v1330_v35  ;;  %2954 = vmatmul.mubr.msk.f32.vlgmr.msra.gmra.mrb[12].mxu1 %vm212_vm2, %v1330_v35 }
0x1606   :  { %3142 = vmatpush3.bf16.msra.mxu1 %v3710_v56  ;;  %2975 = vmatprep.mubr.msk.f32.mxu1 %vm3406_vm1, %v3407_v11 }
0x1607   :  { %3143 = vmatprep.subr.bf16.mxu1 %v3405_v4 }
0x1608   :  { %v1040_v37 = vpop.permute.xlu0 %1039 }
0x1609   :  { %v3769_v39 = vadd.f32 %v1040_v37, %v1032_v36 }
0x160a   :  { %3145 = vmatpush3.bf16.msra.mxu1 %v3720_v59 }
0x160b   :  { %3267 = vtanh.f32 %v3769_v39  ;;  %3152 = vmatprep.subr.bf16.mxu1 %v3405_v4 }
0x1615   :  { %v3268_v41 = vpop.eup %3267 }
0x1616   :  { %1045 = vrot.lane.b32.xlu0 %v3268_v41, %s3408_s23 }
0x1688   :  { %v1046_v45 = vpop.permute.xlu0 %1045 }
0x1689   :  { %v1048_v2 = vmul.f32 %v3266_v32, %v1046_v45 }
0x168b   :  { %1050 = vrot.lane.b32.xlu0 %v1048_v2, %s3409_s7 }
0x16d8   :  { %v1402_v47 = vpop.f32.mrb[12].mxu1 }
0x16d9   :  { %v1406_v48 = vadd.f32 %v1402_v47, %v1176_v46  ;;  %v2955_v49 = vpop.f32.mrb[13].mxu1 }
0x16db   :  { %3269 = vtanh.f32 %v1406_v48  ;;  %v2650_v53 = vmul.f32 -1.442695, %v1406_v48  ;;  %v1191_v48 = vadd.f32 %v3753_v10, %v3697_v44 }
0x16dd   :  { %3271 = vpow2.f32 %v2650_v53 }
0x16e5   :  { %v3270_v50 = vpop.eup %3269 }
0x16e6   :  { %1416 = vrot.lane.b32.xlu1 %v3270_v50, %s3408_s23 }
0x16e7   :  { %v3272_v38 = vpop.eup %3271 }
0x16e8   :  { %v1410_v54 = vadd.f32 1.0, %v3272_v38 }
0x16ea   :  { %3273 = vrcp.f32 %v1410_v54 }
0x16f4   :  { %v3274_v55 = vpop.eup %3273 }
0x16f5   :  { %v1414_v60 = vmul.f32 %v3274_v55, %v1321_v24 }
0x16fd   :  { %v1051_v51 = vpop.permute.xlu0 %1050 }
0x16fe   :  { %1054 = vst.msk [vmem:[#allocation3 + $0x38] sm:$0xff] %vm212_vm2, %v1051_v51  ;;  %1055 = vst.msk [vmem:[#allocation4] sm:$0xff] %vm212_vm2, %v1051_v51 }
0x1705   :  { %v1068_v52 = vld [vmem:[#allocation3 + $0x38] sm:$0xff] }
0x1706   :  { %2932 = vmatmul.mubr.msk.f32.gmra.mrb[20].mxu0 %vm212_vm2, %v1068_v52 }
0x1707   :  { %2964 = vmatprep.mubr.msk.f32.mxu0 %vm3406_vm1, %v3407_v11 }
0x1758   :  { %v1417_v57 = vpop.permute.xlu1 %1416 }
0x1759   :  { %v1419_v58 = vmul.f32 %v3274_v55, %v1417_v57 }
0x175b   :  { %1421 = vrot.lane.b32.xlu1 %v1419_v58, %s3408_s23 }
0x17cd   :  { %v1422_v61 = vpop.permute.xlu1 %1421 }
0x17ce   :  { %v1424_v62 = vadd.f32 %v1422_v61, %v1414_v60 }
0x17d0   :  { %3275 = vtanh.f32 %v1424_v62 }
0x17d9   :  { %v3785_v0 = vpop.f32.mrb[20].mxu0 }
0x17da   :  { %v3276_v3 = vpop.eup %3275  ;;  %v3787_v5 = vpop.f32.mrb[21].mxu0 }
0x17db   :  { %1427 = vrot.lane.b32.xlu1 %v3276_v3, %s3408_s23 }
0x184d   :  { %v1428_v6 = vpop.permute.xlu1 %1427 }
0x184e   :  { %v1430_v8 = vmul.f32 %v3274_v55, %v1428_v6 }
0x1850   :  { %1432 = vrot.lane.b32.xlu1 %v1430_v8, %s3409_s7 }
0x18c2   :  { %v1433_v7 = vpop.permute.xlu1 %1432 }
0x18c3   :  { %1435 = vst.msk [vmem:[#allocation3 + $0x8] sm:$0xff] %vm212_vm2, %v1433_v7  ;;  %2965 = vmatmul.mubr.msk.f32.vlgmr.msra.gmra.mrb[22].mxu0 %vm212_vm2, %v1433_v7  ;;  %v1196_v7 = vadd.f32 %v3695_v43, %v3753_v10 }
0x18c4   :  { %3148 = vmatpush3.bf16.msra.mxu0 %v3710_v56  ;;  %2986 = vmatprep.mubr.msk.f32.mxu0 %vm3406_vm1, %v3407_v11 }
0x18c5   :  { %3149 = vmatprep.subr.bf16.mxu0 %v3405_v4 }
0x18c8   :  { %3151 = vmatpush3.bf16.msra.mxu0 %v3720_v59 }
0x18c9   :  { %3158 = vmatprep.subr.bf16.mxu0 %v3405_v4 }
0x1996   :  { %v1505_v13 = vpop.f32.mrb[22].mxu0 }
0x1997   :  { %v1509_v14 = vadd.f32 %v1505_v13, %v1181_v9  ;;  %v2966_v12 = vpop.f32.mrb[23].mxu0 }
0x1999   :  { %3277 = vtanh.f32 %v1509_v14  ;;  %v2652_v17 = vmul.f32 -1.442695, %v1509_v14 }
0x199b   :  { %3279 = vpow2.f32 %v2652_v17 }
0x19a3   :  { %v3278_v16 = vpop.eup %3277 }
0x19a4   :  { %1519 = vrot.lane.b32.xlu0 %v3278_v16, %s3408_s23 }
0x19a5   :  { %v3280_v63 = vpop.eup %3279 }
0x19a6   :  { %v1513_v15 = vadd.f32 1.0, %v3280_v63 }
0x19a8   :  { %3281 = vrcp.f32 %v1513_v15 }
0x19b2   :  { %v3282_v1 = vpop.eup %3281 }
0x19b3   :  { %v1517_v20 = vmul.f32 %v3282_v1, %v1424_v62 }
0x1a16   :  { %v1520_v18 = vpop.permute.xlu0 %1519 }
0x1a17   :  { %v1522_v19 = vmul.f32 %v3282_v1, %v1520_v18  ;;  %v2071_v18 = vld [vmem:[%s4123_s9 + $0x8] sm:$0xff] }
0x1a19   :  { %1524 = vrot.lane.b32.xlu1 %v1522_v19, %s3408_s23 }
0x1a8b   :  { %v1525_v21 = vpop.permute.xlu1 %1524 }
0x1a8c   :  { %v1527_v42 = vadd.f32 %v1525_v21, %v1517_v20 }
0x1a8e   :  { %3283 = vtanh.f32 %v1527_v42 }
0x1a98   :  { %v3284_v22 = vpop.eup %3283 }
0x1a99   :  { %1530 = vrot.lane.b32.xlu0 %v3284_v22, %s3408_s23  ;;  %v2072_v22 = vld [vmem:[%s4123_s9 + $0x10] sm:$0xff] }
0x1b0b   :  { %v1531_v23 = vpop.permute.xlu0 %1530 }
0x1b0c   :  { %v1533_v24 = vmul.f32 %v3282_v1, %v1531_v23  ;;  %v2070_v1 = vld [vmem:[%s4123_s9] sm:$0xff]  ;;  %v2073_v23 = vld [vmem:[%s4123_s9 + $0x18] sm:$0xff] }
0x1b0d   :  { %v3170_v19 = vpack.c.bf16 %v2071_v18, %v2070_v1 }
0x1b0e   :  { %1535 = vrot.lane.b32.xlu1 %v1533_v24, %s3409_s7  ;;  %v3174_v24 = vpack.c.bf16 %v2073_v23, %v2072_v22 }
0x1b80   :  { %v1536_v25 = vpop.permute.xlu1 %1535 }
0x1b81   :  { %1538 = vst.msk [vmem:[#allocation3 + $0x10] sm:$0xff] %vm212_vm2, %v1536_v25  ;;  %2976 = vmatmul.mubr.msk.f32.vlgmr.msra.gmra.mrb[14].mxu1 %vm212_vm2, %v1536_v25 }
0x1b82   :  { %3154 = vmatpush3.bf16.msra.mxu1 %v3710_v56  ;;  %2997 = vmatprep.mubr.msk.f32.mxu1 %vm3406_vm1, %v3407_v11 }
0x1b83   :  { %3155 = vmatprep.subr.bf16.mxu1 %v3405_v4 }
0x1b86   :  { %3157 = vmatpush3.bf16.msra.mxu1 %v3720_v59 }
0x1b87   :  { %3164 = vmatprep.subr.bf16.mxu1 %v3405_v4 }
0x1c54   :  { %v1608_v27 = vpop.f32.mrb[14].mxu1 }
0x1c55   :  { %v1612_v28 = vadd.f32 %v1608_v27, %v1186_v26  ;;  %v2977_v29 = vpop.f32.mrb[15].mxu1  ;;  %v2062_v26 = vld [vmem:[#allocation3] sm:$0xff]  ;;  %v2063_v27 = vld [vmem:[#allocation3 + $0x8] sm:$0xff] }
0x1c57   :  { %3285 = vtanh.f32 %v1612_v28  ;;  %v2654_v31 = vmul.f32 -1.442695, %v1612_v28  ;;  %v2064_v28 = vld [vmem:[#allocation3 + $0x10] sm:$0xff] }
0x1c59   :  { %3287 = vpow2.f32 %v2654_v31 }
0x1c61   :  { %v3286_v30 = vpop.eup %3285 }
0x1c62   :  { %1622 = vrot.lane.b32.xlu0 %v3286_v30, %s3408_s23 }
0x1c63   :  { %v3288_v32 = vpop.eup %3287 }
0x1c64   :  { %v1616_v33 = vadd.f32 1.0, %v3288_v32  ;;  %v1201_v32 = vadd.f32 %v3753_v10, %v3787_v5 }
0x1c66   :  { %3289 = vrcp.f32 %v1616_v33 }
0x1c70   :  { %v3290_v34 = vpop.eup %3289 }
0x1c71   :  { %v1620_v37 = vmul.f32 %v3290_v34, %v1527_v42 }
0x1cd4   :  { %v1623_v35 = vpop.permute.xlu0 %1622 }
0x1cd5   :  { %v1625_v36 = vmul.f32 %v3290_v34, %v1623_v35 }
0x1cd7   :  { %1627 = vrot.lane.b32.xlu1 %v1625_v36, %s3408_s23 }
0x1d49   :  { %v1628_v41 = vpop.permute.xlu1 %1627 }
0x1d4a   :  { %v1630_v40 = vadd.f32 %v1628_v41, %v1620_v37 }
0x1d4c   :  { %3291 = vtanh.f32 %v1630_v40 }
0x1d56   :  { %v3292_v45 = vpop.eup %3291 }
0x1d57   :  { %1633 = vrot.lane.b32.xlu0 %v3292_v45, %s3408_s23 }
0x1dc9   :  { %v1634_v2 = vpop.permute.xlu0 %1633 }
0x1dca   :  { %v1636_v46 = vmul.f32 %v3290_v34, %v1634_v2 }
0x1dcc   :  { %1638 = vrot.lane.b32.xlu1 %v1636_v46, %s3409_s7 }
0x1e3e   :  { %v1639_v47 = vpop.permute.xlu1 %1638 }
0x1e3f   :  { %1641 = vst.msk [vmem:[#allocation3 + $0x18] sm:$0xff] %vm212_vm2, %v1639_v47  ;;  %2987 = vmatmul.mubr.msk.f32.vlgmr.msra.gmra.mrb[24].mxu0 %vm212_vm2, %v1639_v47 }
0x1e40   :  { %3160 = vmatpush3.bf16.msra.mxu0 %v3710_v56  ;;  %3008 = vmatprep.mubr.msk.f32.mxu0 %vm3406_vm1, %v3407_v11 }
0x1e41   :  { %3161 = vmatprep.subr.bf16.mxu0 %v3405_v4 }
0x1e44   :  { %3163 = vmatpush3.bf16.msra.mxu0 %v3720_v59 }
0x1e45   :  { %3171 = vmatprep.subr.bf16.mxu0 %v3170_v19 }
0x1e46   :  { %v2065_v29 = vld [vmem:[#allocation3 + $0x18] sm:$0xff] }
0x1f12   :  { %v1711_v49 = vpop.f32.mrb[24].mxu0 }
0x1f13   :  { %v1715_v50 = vadd.f32 %v1711_v49, %v1191_v48  ;;  %v2988_v51 = vpop.f32.mrb[25].mxu0 }
0x1f15   :  { %3293 = vtanh.f32 %v1715_v50  ;;  %v2656_v53 = vmul.f32 -1.442695, %v1715_v50 }
0x1f17   :  { %3295 = vpow2.f32 %v2656_v53 }
0x1f1f   :  { %v3294_v52 = vpop.eup %3293 }
0x1f20   :  { %1725 = vrot.lane.b32.xlu0 %v3294_v52, %s3408_s23 }
0x1f21   :  { %v3296_v38 = vpop.eup %3295 }
0x1f22   :  { %v1719_v54 = vadd.f32 1.0, %v3296_v38 }
0x1f24   :  { %3297 = vrcp.f32 %v1719_v54  ;;  %v2426_v54 = vld [vmem:[%s4125_s11] sm:$0xff] }
0x1f2e   :  { %v3298_v55 = vpop.eup %3297 }
0x1f2f   :  { %v1723_v60 = vmul.f32 %v3298_v55, %v1630_v40 }
0x1f92   :  { %v1726_v57 = vpop.permute.xlu0 %1725 }
0x1f93   :  { %v1728_v58 = vmul.f32 %v3298_v55, %v1726_v57 }
0x1f95   :  { %1730 = vrot.lane.b32.xlu1 %v1728_v58, %s3408_s23 }
0x2007   :  { %v1731_v61 = vpop.permute.xlu1 %1730 }
0x2008   :  { %v1733_v44 = vadd.f32 %v1731_v61, %v1723_v60 }
0x200a   :  { %3299 = vtanh.f32 %v1733_v44 }
0x2014   :  { %v3300_v62 = vpop.eup %3299 }
0x2015   :  { %1736 = vrot.lane.b32.xlu0 %v3300_v62, %s3408_s23 }
0x2087   :  { %v1737_v3 = vpop.permute.xlu0 %1736 }
0x2088   :  { %v1739_v6 = vmul.f32 %v3298_v55, %v1737_v3  ;;  %v2427_v55 = vld [vmem:[%s4125_s11 + $0x8] sm:$0xff] }
0x2089   :  { %v3878_v57 = vpack.c.bf16 %v2427_v55, %v2426_v54 }
0x208a   :  { %1741 = vrot.lane.b32.xlu1 %v1739_v6, %s3409_s7 }
0x20fc   :  { %v1742_v8 = vpop.permute.xlu1 %1741 }
0x20fd   :  { %1744 = vst.msk [vmem:[#allocation3 + $0x20] sm:$0xff] %vm212_vm2, %v1742_v8  ;;  %2998 = vmatmul.mubr.msk.f32.vlgmr.msra.gmra.mrb[16].mxu1 %vm212_vm2, %v1742_v8 }
0x20fe   :  { %3166 = vmatpush3.bf16.msra.mxu1 %v3710_v56  ;;  %3019 = vmatprep.mubr.msk.f32.mxu1 %vm3406_vm1, %v3407_v11 }
0x20ff   :  { %3167 = vmatprep.subr.bf16.mxu1 %v3405_v4 }
0x2102   :  { %3169 = vmatpush3.bf16.msra.mxu1 %v3720_v59 }
0x2103   :  { %3179 = vmatprep.subr.bf16.mxu1 %v3878_v57 }
0x2104   :  { %v2066_v30 = vld [vmem:[#allocation3 + $0x20] sm:$0xff] }
0x21d0   :  { %v1814_v9 = vpop.f32.mrb[16].mxu1 }
0x21d1   :  { %v1818_v13 = vadd.f32 %v1814_v9, %v1196_v7  ;;  %v2999_v14 = vpop.f32.mrb[17].mxu1 }
0x21d3   :  { %3301 = vtanh.f32 %v1818_v13  ;;  %v2658_v16 = vmul.f32 -1.442695, %v1818_v13 }
0x21d5   :  { %3303 = vpow2.f32 %v2658_v16 }
0x21dd   :  { %v3302_v12 = vpop.eup %3301 }
0x21de   :  { %1828 = vrot.lane.b32.xlu0 %v3302_v12, %s3408_s23 }
0x21df   :  { %v3304_v56 = vpop.eup %3303 }
0x21e0   :  { %v1822_v17 = vadd.f32 1.0, %v3304_v56 }
0x21e2   :  { %3305 = vrcp.f32 %v1822_v17 }
0x21ec   :  { %v3306_v11 = vpop.eup %3305 }
0x21ed   :  { %v1826_v59 = vmul.f32 %v3306_v11, %v1733_v44  ;;  %v3886_v44 = vld [vmem:[%s4124_s10] ss:$0 sm:$0xff] }
0x2250   :  { %v1829_v63 = vpop.permute.xlu0 %1828 }
0x2251   :  { %v1831_v4 = vmul.f32 %v3306_v11, %v1829_v63 }
0x2253   :  { %1833 = vrot.lane.b32.xlu1 %v1831_v4, %s3408_s23 }
0x22c5   :  { %v1834_v15 = vpop.permute.xlu1 %1833 }
0x22c6   :  { %v1836_v43 = vadd.f32 %v1834_v15, %v1826_v59 }
0x22c8   :  { %3307 = vtanh.f32 %v1836_v43 }
0x22d2   :  { %v3308_v20 = vpop.eup %3307 }
0x22d3   :  { %1839 = vrot.lane.b32.xlu0 %v3308_v20, %s3408_s23 }
0x2345   :  { %v1840_v21 = vpop.permute.xlu0 %1839 }
0x2346   :  { %v1842_v42 = vmul.f32 %v3306_v11, %v1840_v21 }
0x2348   :  { %1844 = vrot.lane.b32.xlu1 %v1842_v42, %s3409_s7 }
0x23ba   :  { %v1845_v25 = vpop.permute.xlu1 %1844 }
0x23bb   :  { %1847 = vst.msk [vmem:[#allocation3 + $0x28] sm:$0xff] %vm212_vm2, %v1845_v25  ;;  %3009 = vmatmul.mubr.msk.f32.vlgmr.msra.gmra.mrb[26].mxu0 %vm212_vm2, %v1845_v25 }
0x23bc   :  { %3173 = vmatpush3.bf16.msra.mxu0 %v3170_v19  ;;  %3030 = vmatprep.mubr.msk.f32.mxu0 %vm212_vm2, %v2062_v26 }
0x23bd   :  { %3175 = vmatprep.subr.bf16.mxu0 %v3174_v24 }
0x23c0   :  { %3177 = vmatpush3.bf16.msra.mxu0 %v3174_v24 }
0x23c2   :  { %v2067_v31 = vld [vmem:[#allocation3 + $0x28] sm:$0xff] }
0x23c3   :  { %3031 = vmatmul.mubr.msk.f32.vlgmr.msra.gmra.mrb[28].mxu0 %vm212_vm2, %v2063_v27 }
0x23c4   :  { %3033 = vmatprep.mubr.msk.f32.mxu0 %vm212_vm2, %v2064_v28 }
0x23c7   :  { %3034 = vmatmul.mubr.msk.f32.gmra.mrb[30].mxu0 %vm212_vm2, %v2065_v29 }
0x23c8   :  { %3036 = vmatprep.mubr.msk.f32.mxu0 %vm212_vm2, %v2066_v30 }
0x23cb   :  { %3037 = vmatmul.mubr.msk.f32.gmra.mrb[32].mxu0 %vm212_vm2, %v2067_v31 }
0x248e   :  { %v1917_v33 = vpop.f32.mrb[26].mxu0 }
0x248f   :  { %v1921_v34 = vadd.f32 %v1917_v33, %v1201_v32  ;;  %v3010_v35 = vpop.f32.mrb[27].mxu0 }
0x2491   :  { %3309 = vtanh.f32 %v1921_v34  ;;  %v2660_v47 = vmul.f32 -1.442695, %v1921_v34 }
0x2493   :  { %3311 = vpow2.f32 %v2660_v47 }
0x2496   :  { %v3032_v36 = vpop.f32.mrb[28].mxu0 }
0x2497   :  { %v2171_v37 = vpop.f32.mrb[29].mxu0  ;;  %v3895_v6 = vadd.f32 %v3032_v36, %v3886_v44 }
0x2498   :  { %v3889_v62 = vadd.f32 %v3886_v44, %v2171_v37 }
0x2499   :  { %v3902_v9 = vmul.f32 0.70710677, %v3895_v6 }
0x249a   :  { %v3035_v41 = vpop.f32.mrb[30].mxu0  ;;  %v3892_v3 = vmul.f32 0.70710677, %v3889_v62 }
0x249b   :  { %v3310_v40 = vpop.eup %3309  ;;  %v2181_v45 = vpop.f32.mrb[31].mxu0  ;;  %v3905_v13 = vadd.f32 %v3035_v41, %v3886_v44  ;;  %v2243_v56 = vand.u32 2147483647, %v3902_v9  ;;  %vm2227_vm4 = vcmp.ge.f32.partialorder %v3902_v9, 0.0 }
0x249c   :  { %1931 = vrot.lane.b32.xlu0 %v3310_v40, %s3408_s23  ;;  %v2242_v8 = vand.u32 2147483647, %v3892_v3  ;;  %v3899_v7 = vadd.f32 %v3886_v44, %v2181_v45  ;;  %vm2226_vm3 = vcmp.ge.f32.partialorder %v3892_v3, 0.0 }
0x249d   :  { %v3312_v48 = vpop.eup %3311  ;;  %v3915_v17 = vmul.f32 0.70710677, %v3905_v13  ;;  %v2251_v15 = vmul.f32 0.3275911, %v2243_v56  ;;  %v2355_v55 = vsub.f32 0.0, %v2243_v56 }
0x249e   :  { %v3038_v2 = vpop.f32.mrb[32].mxu0  ;;  %v1925_v49 = vadd.f32 1.0, %v3312_v48  ;;  %v2250_v14 = vmul.f32 0.3275911, %v2242_v8  ;;  %v3908_v12 = vmul.f32 0.70710677, %v3899_v7 }
0x249f   :  { %v2191_v46 = vpop.f32.mrb[33].mxu0  ;;  %v3918_v11 = vadd.f32 %v3038_v2, %v3886_v44  ;;  %v2259_v20 = vadd.f32 1.0, %v2251_v15  ;;  %v2354_v48 = vsub.f32 0.0, %v2242_v8  ;;  %vm2229_vm6 = vcmp.ge.f32.partialorder %v3915_v17, 0.0 }
0x24a0   :  { %3313 = vrcp.f32 %v1925_v49  ;;  %v3911_v16 = vadd.f32 %v3886_v44, %v2191_v46  ;;  %v2258_v63 = vadd.f32 1.0, %v2250_v14  ;;  %v3921_v4 = vand.u32 2147483647, %v3908_v12 }
0x24a1   :  { %v3930_v1 = vmul.f32 0.70710677, %v3918_v11  ;;  %v2362_v54 = vmul.f32 %v2354_v48, %v2242_v8  ;;  %vm2228_vm5 = vcmp.ge.f32.partialorder %v3908_v12, 0.0 }
0x24a2   :  { %v3924_v59 = vmul.f32 0.70710677, %v3911_v16  ;;  %v2252_v18 = vmul.f32 0.3275911, %v3921_v4 }
0x24a3   :  { %v3938_v42 = vand.u32 2147483647, %v3930_v1  ;;  %vm2231_vm8 = vcmp.ge.f32.partialorder %v3930_v1, 0.0 }
0x24a4   :  { %v3934_v19 = vand.u32 2147483647, %v3924_v59  ;;  %v2260_v22 = vadd.f32 1.0, %v2252_v18  ;;  %v2370_v18 = vmul.f32 1.442695, %v2362_v54  ;;  %vm2230_vm7 = vcmp.ge.f32.partialorder %v3924_v59, 0.0 }
0x24a5   :  { %v2255_v25 = vmul.f32 0.3275911, %v3938_v42 }
0x24a6   :  { %v2254_v23 = vmul.f32 0.3275911, %v3934_v19 }
0x24a7   :  { %v2263_v28 = vadd.f32 1.0, %v2255_v25 }
0x24a8   :  { %v2262_v26 = vadd.f32 1.0, %v2254_v23 }
0x24aa   :  { %v3314_v50 = vpop.eup %3313 }
0x24ab   :  { %v1929_v52 = vmul.f32 %v3314_v50, %v1836_v43  ;;  %v3927_v43 = vand.u32 2147483647, %v3915_v17 }
0x24ad   :  { %v2253_v21 = vmul.f32 0.3275911, %v3927_v43 }
0x24af   :  { %v2261_v24 = vadd.f32 1.0, %v2253_v21  ;;  %v2363_v21 = vmul.f32 %v2355_v55, %v2243_v56 }
0x250e   :  { %v1932_v5 = vpop.permute.xlu0 %1931 }
0x250f   :  { %v1934_v51 = vmul.f32 %v3314_v50, %v1932_v5 }
0x2511   :  { %1936 = vrot.lane.b32.xlu1 %v1934_v51, %s3408_s23 }
0x2583   :  { %v1937_v53 = vpop.permute.xlu1 %1936 }
0x2584   :  { %v3869_v38 = vadd.f32 %v1937_v53, %v1929_v52 }
0x2586   :  { %3315 = vtanh.f32 %v3869_v38 }
0x2587   :  { %3317 = vrcp.f32 %v2258_v63 }
0x2588   :  { %3319 = vrcp.f32 %v2259_v20  ;;  %v2356_v20 = vsub.f32 0.0, %v3921_v4 }
0x2589   :  { %3321 = vrcp.f32 %v2260_v22 }
0x258a   :  { %3323 = vrcp.f32 %v2261_v24  ;;  %v2357_v24 = vsub.f32 0.0, %v3927_v43 }
0x258b   :  { %3325 = vrcp.f32 %v2262_v26 }
0x258c   :  { %3327 = vrcp.f32 %v2263_v28 }
0x258d   :  { %3329 = vpow2.f32 %v2370_v18 }
0x2590   :  { %v3316_v58 = vpop.eup %3315 }
0x2591   :  { %1942 = vrot.lane.b32.xlu0 %v3316_v58, %s3408_s23  ;;  %v3942_v27 = vpop.eup %3317 }
0x2592   :  { %v2282_v29 = vmul.f32 1.0614054, %v3942_v27  ;;  %v3945_v30 = vpop.eup %3319 }
0x2593   :  { %v3947_v32 = vpop.eup %3321  ;;  %v2283_v33 = vmul.f32 1.0614054, %v3945_v30 }
0x2594   :  { %v2290_v31 = vadd.f32 -1.4531521, %v2282_v29  ;;  %v3950_v34 = vpop.eup %3323  ;;  %v2284_v36 = vmul.f32 1.0614054, %v3947_v32  ;;  %v2364_v29 = vmul.f32 %v2356_v20, %v3921_v4 }
0x2595   :  { %v3954_v37 = vpop.eup %3325  ;;  %v2291_v41 = vadd.f32 -1.4531521, %v2283_v33  ;;  %v2285_v40 = vmul.f32 1.0614054, %v3950_v34  ;;  %v2372_v33 = vmul.f32 1.442695, %v2363_v21 }
0x2596   :  { %v2298_v35 = vmul.f32 %v3942_v27, %v2290_v31  ;;  %v3957_v45 = vpop.eup %3327  ;;  %v2292_v46 = vadd.f32 -1.4531521, %v2284_v36  ;;  %v2286_v47 = vmul.f32 1.0614054, %v3954_v37  ;;  %v2358_v31 = vsub.f32 0.0, %v3934_v19 }
0x2597   :  { %v2299_v49 = vmul.f32 %v3945_v30, %v2291_v41  ;;  %v2287_v5 = vmul.f32 1.0614054, %v3957_v45  ;;  %v2365_v36 = vmul.f32 %v2357_v24, %v3927_v43  ;;  %v2374_v48 = vmul.f32 1.442695, %v2364_v29 }
0x2598   :  { %v2306_v2 = vadd.f32 1.4214138, %v2298_v35  ;;  %v2300_v52 = vmul.f32 %v3947_v32, %v2292_v46  ;;  %v2294_v53 = vadd.f32 -1.4531521, %v2286_v47  ;;  %v2359_v46 = vsub.f32 0.0, %v3938_v42 }
0x2599   :  { %v2307_v58 = vadd.f32 1.4214138, %v2299_v49  ;;  %v2366_v49 = vmul.f32 %v2358_v31, %v3934_v19  ;;  %3331 = vpow2.f32 %v2372_v33 }
0x259a   :  { %v2314_v51 = vmul.f32 %v3942_v27, %v2306_v2  ;;  %v2308_v63 = vadd.f32 1.4214138, %v2300_v52  ;;  %v2302_v15 = vmul.f32 %v3954_v37, %v2294_v53  ;;  %v2367_v53 = vmul.f32 %v2359_v46, %v3938_v42 }
0x259b   :  { %v2315_v22 = vmul.f32 %v3945_v30, %v2307_v58  ;;  %3333 = vpow2.f32 %v2374_v48  ;;  %v2378_v55 = vmul.f32 1.442695, %v2366_v49  ;;  %v3330_v58 = vpop.eup %3329  ;;  %v2210_v48 = vmul.f32 0.5, %v3889_v62 }
0x259c   :  { %v2322_v14 = vadd.f32 -0.28449672, %v2314_v51  ;;  %v2316_v26 = vmul.f32 %v3947_v32, %v2308_v63  ;;  %v2310_v28 = vadd.f32 1.4214138, %v2302_v15  ;;  %v2380_v15 = vmul.f32 1.442695, %v2367_v53 }
0x259d   :  { %v2323_v35 = vadd.f32 -0.28449672, %v2315_v22 }
0x259e   :  { %v2330_v25 = vmul.f32 %v3942_v27, %v2322_v14  ;;  %v2324_v2 = vadd.f32 -0.28449672, %v2316_v26  ;;  %v2318_v47 = vmul.f32 %v3954_v37, %v2310_v28  ;;  %v3410_v26 = vmov -1.0  }
0x259f   :  { %v2331_v4 = vmul.f32 %v3945_v30, %v2323_v35  ;;  %v2234_v28 = vsel %vm2226_vm3, 1.0, %v3410_v26  ;;  %v2235_v9 = vsel %vm2227_vm4, 1.0, %v3410_v26  ;;  %v2236_v12 = vsel %vm2228_vm5, 1.0, %v3410_v26 }
0x25a0   :  { %v2332_v43 = vmul.f32 %v3947_v32, %v2324_v2  ;;  %v2326_v54 = vadd.f32 -0.28449672, %v2318_v47  ;;  %v2237_v62 = vsel %vm2229_vm6, 1.0, %v3410_v26 }
0x25a2   :  { %v2340_v63 = vadd.f32 0.2548296, %v2332_v43  ;;  %v2334_v18 = vmul.f32 %v3954_v37, %v2326_v54 }
0x25a3   :  { %v3332_v21 = vpop.eup %3331 }
0x25a4   :  { %v2342_v24 = vadd.f32 0.2548296, %v2334_v18 }
0x25a6   :  { %v2350_v3 = vmul.f32 %v3954_v37, %v2342_v24  ;;  %v2429_v37 = vld [vmem:[%s4125_s11 + $0x18] sm:$0xff] }
0x2603   :  { %v1943_v60 = vpop.permute.xlu0 %1942 }
0x2604   :  { %v1945_v61 = vmul.f32 %v3314_v50, %v1943_v60  ;;  %v2293_v50 = vadd.f32 -1.4531521, %v2285_v40  ;;  %v2338_v40 = vadd.f32 0.2548296, %v2330_v25 }
0x2606   :  { %1947 = vrot.lane.b32.xlu1 %v1945_v61, %s3409_s7  ;;  %v2301_v60 = vmul.f32 %v3950_v34, %v2293_v50  ;;  %v2295_v61 = vadd.f32 -1.4531521, %v2287_v5  ;;  %v2376_v5 = vmul.f32 1.442695, %v2365_v36  ;;  %v2346_v52 = vmul.f32 %v3942_v27, %v2338_v40 }
0x2608   :  { %v2309_v23 = vadd.f32 1.4214138, %v2301_v60  ;;  %v2303_v8 = vmul.f32 %v3957_v45, %v2295_v61  ;;  %v2339_v60 = vadd.f32 0.2548296, %v2331_v4  ;;  %3335 = vpow2.f32 %v2376_v5 }
0x2609   :  { %v2386_v14 = vmul.f32 %v3330_v58, %v2346_v52  ;;  %3337 = vpow2.f32 %v2378_v55  ;;  %v2238_v55 = vsel %vm2230_vm7, 1.0, %v3410_v26 }
0x260a   :  { %v2317_v56 = vmul.f32 %v3950_v34, %v2309_v23  ;;  %v2311_v41 = vadd.f32 1.4214138, %v2303_v8  ;;  %v2347_v27 = vmul.f32 %v3945_v30, %v2339_v60  ;;  %v2348_v23 = vmul.f32 %v3947_v32, %v2340_v63  ;;  %v3334_v8 = vpop.eup %3333 }
0x260b   :  { %v2394_v22 = vsub.f32 1.0, %v2386_v14  ;;  %3339 = vpow2.f32 %v2380_v15  ;;  %v2211_v60 = vmul.f32 0.5, %v3895_v6 }
0x260c   :  { %v2325_v50 = vadd.f32 -0.28449672, %v2317_v56  ;;  %v2319_v51 = vmul.f32 %v3957_v45, %v2311_v41  ;;  %v2387_v25 = vmul.f32 %v3332_v21, %v2347_v27  ;;  %v2388_v33 = vmul.f32 %v3334_v8, %v2348_v23  ;;  %v4031_v8 = vld [vmem:[%s4126_s12] ss:$0 sm:$0xff] }
0x260d   :  { %v2402_v30 = vmul.f32 %v2394_v22, %v2234_v28  ;;  %v2213_v27 = vmul.f32 0.5, %v3905_v13  ;;  %v2215_v21 = vmul.f32 0.5, %v3918_v11  ;;  %v1206_v13 = vadd.f32 %v3785_v0, %v3753_v10 }
0x260e   :  { %v2333_v19 = vmul.f32 %v3950_v34, %v2325_v50  ;;  %v2327_v61 = vadd.f32 -0.28449672, %v2319_v51  ;;  %v2395_v36 = vsub.f32 1.0, %v2387_v25  ;;  %v2396_v2 = vsub.f32 1.0, %v2388_v33 }
0x260f   :  { %v2410_v40 = vadd.f32 1.0, %v2402_v30 }
0x2610   :  { %v2341_v42 = vadd.f32 0.2548296, %v2333_v19  ;;  %v2335_v20 = vmul.f32 %v3957_v45, %v2327_v61  ;;  %v2404_v51 = vmul.f32 %v2396_v2, %v2236_v12  ;;  %v2212_v19 = vmul.f32 0.5, %v3899_v7 }
0x2611   :  { %v2418_v5 = vmul.f32 %v2410_v40, %v2210_v48  ;;  %v2239_v61 = vsel %vm2231_vm8, 1.0, %v3410_v26 }
0x2612   :  { %v2349_v29 = vmul.f32 %v3950_v34, %v2341_v42  ;;  %v2343_v31 = vadd.f32 0.2548296, %v2335_v20  ;;  %v3336_v35 = vpop.eup %3335  ;;  %v2428_v34 = vld [vmem:[%s4125_s11 + $0x10] sm:$0xff]  ;;  %v2412_v59 = vadd.f32 1.0, %v2404_v51  ;;  %v2214_v42 = vmul.f32 0.5, %v3911_v16 }
0x2613   :  { %v3338_v56 = vpop.eup %3337  ;;  %v3182_v50 = vpack.c.bf16 %v2429_v37, %v2428_v34 }
0x2614   :  { %v2389_v32 = vmul.f32 %v3336_v35, %v2349_v29  ;;  %v2351_v41 = vmul.f32 %v3957_v45, %v2343_v31  ;;  %v2390_v46 = vmul.f32 %v3338_v56, %v2350_v3  ;;  %v2403_v45 = vmul.f32 %v2395_v36, %v2235_v9 }
0x2615   :  { %v3340_v47 = vpop.eup %3339  ;;  %v2420_v63 = vmul.f32 %v2412_v59, %v2212_v19 }
0x2616   :  { %v2397_v49 = vsub.f32 1.0, %v2389_v32  ;;  %v2391_v4 = vmul.f32 %v3340_v47, %v2351_v41  ;;  %v2398_v52 = vsub.f32 1.0, %v2390_v46  ;;  %v2411_v17 = vadd.f32 1.0, %v2403_v45 }
0x2618   :  { %v2405_v53 = vmul.f32 %v2397_v49, %v2237_v62  ;;  %v2399_v54 = vsub.f32 1.0, %v2391_v4  ;;  %v2406_v58 = vmul.f32 %v2398_v52, %v2238_v55  ;;  %v2419_v1 = vmul.f32 %v2411_v17, %v2211_v60 }
0x261a   :  { %v2413_v14 = vadd.f32 1.0, %v2405_v53  ;;  %v2414_v15 = vadd.f32 1.0, %v2406_v58 }
0x261c   :  { %v2421_v6 = vmul.f32 %v2413_v14, %v2213_v27  ;;  %v2422_v20 = vmul.f32 %v2414_v15, %v2214_v42 }
0x2678   :  { %v1948_v43 = vpop.permute.xlu1 %1947 }
0x2679   :  { %1950 = vst.msk [vmem:[#allocation3 + $0x30] sm:$0xff] %vm212_vm2, %v1948_v43  ;;  %3020 = vmatmul.mubr.msk.f32.vlgmr.msra.gmra.mrb[18].mxu1 %vm212_vm2, %v1948_v43 }
0x267a   :  { %3181 = vmatpush3.bf16.msra.mxu1 %v3878_v57  ;;  %3050 = vmatprep.mubr.msk.f32.mxu1 %vm212_vm2, %v2418_v5  ;;  %v2407_v57 = vmul.f32 %v2399_v54, %v2239_v61 }
0x267b   :  { %3183 = vmatprep.subr.bf16.mxu1 %v3182_v50 }
0x267c   :  { %v2415_v7 = vadd.f32 1.0, %v2407_v57 }
0x267e   :  { %3185 = vmatpush3.bf16.msra.mxu1 %v3182_v50  ;;  %v2423_v22 = vmul.f32 %v2415_v7, %v2215_v21 }
0x2680   :  { %v2068_v18 = vld [vmem:[#allocation3 + $0x30] sm:$0xff] }
0x2681   :  { %3051 = vmatmul.mubr.msk.f32.vlgmr.msra.gmra.mrb[20].mxu1 %vm212_vm2, %v2419_v1  ;;  %3039 = vmatprep.mubr.msk.f32.mxu0 %vm212_vm2, %v2068_v18 }
0x2682   :  { %3053 = vmatprep.mubr.msk.f32.mxu1 %vm212_vm2, %v2420_v63 }
0x2685   :  { %3054 = vmatmul.mubr.msk.f32.gmra.mrb[22].mxu1 %vm212_vm2, %v2421_v6 }
0x2686   :  { %3056 = vmatprep.mubr.msk.f32.mxu1 %vm212_vm2, %v2422_v20 }
0x2689   :  { %3057 = vmatmul.mubr.msk.f32.gmra.mrb[24].mxu1 %vm212_vm2, %v2423_v22 }
0x274c   :  { %v2020_v23 = vpop.f32.mrb[18].mxu1 }
0x274d   :  { %v2024_v24 = vadd.f32 %v2020_v23, %v1206_v13  ;;  %v3021_v16 = vpop.f32.mrb[19].mxu1 }
0x274f   :  { %3341 = vtanh.f32 %v2024_v24  ;;  %v2662_v32 = vmul.f32 -1.442695, %v2024_v24 }
0x2751   :  { %3343 = vpow2.f32 %v2662_v32 }
0x2754   :  { %v3052_v11 = vpop.f32.mrb[20].mxu1 }
0x2755   :  { %v2533_v25 = vadd.f32 %v3052_v11, %v4031_v8  ;;  %v2527_v28 = vpop.f32.mrb[21].mxu1 }
0x2756   :  { %v2528_v29 = vadd.f32 %v4031_v8, %v2527_v28 }
0x2757   :  { %2568 = vst.msk [vmem:[%s4127_s13 + $0x8] sm:$0xff] %vm2566_vm9, %v2533_v25 }
0x2758   :  { %2567 = vst.msk [vmem:[%s4127_s13] sm:$0xff] %vm2566_vm9, %v2528_v29  ;;  %v3055_v10 = vpop.f32.mrb[22].mxu1 }
0x2759   :  { %v3342_v0 = vpop.eup %3341  ;;  %v2543_v31 = vadd.f32 %v3055_v10, %v4031_v8  ;;  %v2537_v30 = vpop.f32.mrb[23].mxu1 }
0x275a   :  { %v2538_v33 = vadd.f32 %v4031_v8, %v2537_v30  ;;  %2034 = vrot.lane.b32.xlu0 %v3342_v0, %s3408_s23 }
0x275b   :  { %2570 = vst.msk [vmem:[%s4127_s13 + $0x18] sm:$0xff] %vm2566_vm9, %v2543_v31  ;;  %v3344_v41 = vpop.eup %3343 }
0x275c   :  { %2569 = vst.msk [vmem:[%s4127_s13 + $0x10] sm:$0xff] %vm2566_vm9, %v2538_v33  ;;  %v3058_v3 = vpop.f32.mrb[24].mxu1  ;;  %v2028_v40 = vadd.f32 1.0, %v3344_v41 }
0x275d   :  { %v2553_v35 = vadd.f32 %v3058_v3, %v4031_v8  ;;  %v2547_v56 = vpop.f32.mrb[25].mxu1 }
0x275e   :  { %v2548_v36 = vadd.f32 %v4031_v8, %v2547_v56  ;;  %3345 = vrcp.f32 %v2028_v40 }
0x275f   :  { %2572 = vst.msk [vmem:[%s4127_s13 + $0x28] sm:$0xff] %vm2566_vm9, %v2553_v35 }
0x2760   :  { %2571 = vst.msk [vmem:[%s4127_s13 + $0x20] sm:$0xff] %vm2566_vm9, %v2548_v36 }
0x2768   :  { %v3346_v2 = vpop.eup %3345 }
0x2769   :  { %v2032_v37 = vmul.f32 %v3346_v2, %v3869_v38 }
0x27cc   :  { %v2035_v46 = vpop.permute.xlu0 %2034 }
0x27cd   :  { %v2037_v34 = vmul.f32 %v3346_v2, %v2035_v46 }
0x27cf   :  { %2039 = vrot.lane.b32.xlu1 %v2037_v34, %s3408_s23 }
0x2841   :  { %v2040_v47 = vpop.permute.xlu1 %2039 }
0x2842   :  { %v2042_v9 = vadd.f32 %v2040_v47, %v2032_v37 }
0x2844   :  { %3347 = vtanh.f32 %v2042_v9 }
0x284e   :  { %v3348_v48 = vpop.eup %3347 }
0x284f   :  { %2045 = vrot.lane.b32.xlu0 %v3348_v48, %s3408_s23  ;;  %s3412_s23 = smov [#allocation4]  }
0x2853   :  { %1057 = vrot.lane.b32.xlu0 %v3769_v39, %s3411_s27 }
0x28c1   :  { %v2046_v12 = vpop.permute.xlu0 %2045 }
0x28c2   :  { %v2048_v45 = vmul.f32 %v3346_v2, %v2046_v12 }
0x28c4   :  { %2050 = vrot.lane.b32.xlu1 %v2048_v45, %s3409_s7  ;;  %s2582_s7 = sshll.u32 %s3412_s23, 4  ;;  %s2583_s7 = int_to_ptr.vmem [resolvable:$true] %s2582_s7 }
0x28c5   :  { %v1058_v49 = vpop.permute.xlu0 %1057  ;;  %s3357_s28 = scalar_lea.vmem %s2583_s7, 256  ;;  %p3362_p1 = scmp.lt.s32.totalorder %s2583_s7, %s2583_s7 }
0x28c6   :  { %1060 = vst.msk [vmem:[#allocation6] sm:$0xff] %vm212_vm2, %v1058_v49  ;;  %p3358_p0 = scmp.ne.s32.totalorder %s2583_s7, %s3357_s28  ;;  %p3363_p2 = scmp.lt.s32.totalorder %s3357_s28, %s3357_s28 }
0x28c8   :  { %2057 = vrot.lane.b32.xlu1 %v2042_v9, %s3411_s27  ;;  %p3364_p3 = por %p3363_p2, %p3362_p1 }
0x28ca   :  { %p3365_p4 = pnand %p3364_p3, %p3358_p0 }
0x2936   :  { %v2051_v4 = vpop.permute.xlu1 %2050 }
0x2937   :  { %2053 = vst.msk [vmem:[#allocation3 + $0x38] sm:$0xff] %vm212_vm2, %v2051_v4  ;;  %2055 = vst.msk [vmem:[#allocation4 + $0x8] sm:$0xff] %vm212_vm2, %v2051_v4 }
0x293a   :  { %v2058_v38 = vpop.permute.xlu1 %2057 }
0x293b   :  { %2061 = vst.msk [vmem:[#allocation6 + $0x8] sm:$0xff] %vm212_vm2, %v2058_v38 }
0x293e   :  { %v2069_v50 = vld [vmem:[#allocation3 + $0x38] sm:$0xff] }
0x293f   :  { %3040 = vmatmul.mubr.msk.f32.gmra.mrb[34].mxu0 %vm212_vm2, %v2069_v50 }
0x2a12   :  { %v3041_v39 = vpop.f32.mrb[34].mxu0 }
0x2a13   :  { %v2207_v5 = vadd.f32 %v3041_v39, %v3886_v44  ;;  %v2201_v51 = vpop.f32.mrb[35].mxu0 }
0x2a14   :  { %v2202_v52 = vadd.f32 %v3886_v44, %v2201_v51 }
0x2a15   :  { %v2225_v43 = vmul.f32 0.70710677, %v2207_v5  ;;  %v2217_v34 = vmul.f32 0.5, %v2207_v5 }
0x2a16   :  { %v2224_v62 = vmul.f32 0.70710677, %v2202_v52  ;;  %v2216_v2 = vmul.f32 0.5, %v2202_v52 }
0x2a17   :  { %v2249_v17 = vand.u32 2147483647, %v2225_v43  ;;  %vm2233_vm10 = vcmp.ge.f32.partialorder %v2225_v43, 0.0 }
0x2a18   :  { %v2248_v53 = vand.u32 2147483647, %v2224_v62  ;;  %vm2232_vm11 = vcmp.ge.f32.partialorder %v2224_v62, 0.0  ;;  %v2241_v35 = vsel %vm2233_vm10, 1.0, %v3410_v26 }
0x2a19   :  { %v2257_v54 = vmul.f32 0.3275911, %v2249_v17  ;;  %v2361_v60 = vsub.f32 0.0, %v2249_v17  ;;  %v2240_v32 = vsel %vm2232_vm11, 1.0, %v3410_v26 }
0x2a1a   :  { %v2256_v55 = vmul.f32 0.3275911, %v2248_v53  ;;  %v2360_v19 = vsub.f32 0.0, %v2248_v53 }
0x2a1b   :  { %v2265_v59 = vadd.f32 1.0, %v2257_v54  ;;  %v2369_v1 = vmul.f32 %v2361_v60, %v2249_v17 }
0x2a1c   :  { %v2264_v58 = vadd.f32 1.0, %v2256_v55  ;;  %v2368_v63 = vmul.f32 %v2360_v19, %v2248_v53 }
0x2a1d   :  { %3349 = vrcp.f32 %v2265_v59  ;;  %v2384_v44 = vmul.f32 1.442695, %v2369_v1 }
0x2a1e   :  { %3351 = vrcp.f32 %v2264_v58  ;;  %v2382_v6 = vmul.f32 1.442695, %v2368_v63 }
0x2a1f   :  { %3353 = vpow2.f32 %v2384_v44 }
0x2a20   :  { %3355 = vpow2.f32 %v2382_v6 }
0x2a27   :  { %v3350_v61 = vpop.eup %3349 }
0x2a28   :  { %v3352_v14 = vpop.eup %3351  ;;  %v2289_v57 = vmul.f32 1.0614054, %v3350_v61 }
0x2a29   :  { %v2288_v15 = vmul.f32 1.0614054, %v3352_v14  ;;  %v3354_v10 = vpop.eup %3353 }
0x2a2a   :  { %v2297_v18 = vadd.f32 -1.4531521, %v2289_v57  ;;  %v3356_v31 = vpop.eup %3355 }
0x2a2b   :  { %v2296_v27 = vadd.f32 -1.4531521, %v2288_v15 }
0x2a2c   :  { %v2305_v42 = vmul.f32 %v3350_v61, %v2297_v18 }
0x2a2d   :  { %v2304_v7 = vmul.f32 %v3352_v14, %v2296_v27 }
0x2a2e   :  { %v2313_v20 = vadd.f32 1.4214138, %v2305_v42 }
0x2a2f   :  { %v2312_v21 = vadd.f32 1.4214138, %v2304_v7 }
0x2a30   :  { %v2321_v22 = vmul.f32 %v3350_v61, %v2313_v20 }
0x2a31   :  { %v2320_v13 = vmul.f32 %v3352_v14, %v2312_v21 }
0x2a32   :  { %v2329_v23 = vadd.f32 -0.28449672, %v2321_v22 }
0x2a33   :  { %v2328_v24 = vadd.f32 -0.28449672, %v2320_v13 }
0x2a34   :  { %v2337_v16 = vmul.f32 %v3350_v61, %v2329_v23 }
0x2a35   :  { %v2336_v11 = vmul.f32 %v3352_v14, %v2328_v24 }
0x2a36   :  { %v2345_v25 = vadd.f32 0.2548296, %v2337_v16 }
0x2a37   :  { %v2344_v28 = vadd.f32 0.2548296, %v2336_v11 }
0x2a38   :  { %v2353_v29 = vmul.f32 %v3350_v61, %v2345_v25 }
0x2a39   :  { %v2352_v0 = vmul.f32 %v3352_v14, %v2344_v28 }
0x2a3a   :  { %v2393_v30 = vmul.f32 %v3354_v10, %v2353_v29 }
0x2a3b   :  { %v2392_v33 = vmul.f32 %v3356_v31, %v2352_v0 }
0x2a3c   :  { %v2401_v3 = vsub.f32 1.0, %v2393_v30 }
0x2a3d   :  { %v2400_v56 = vsub.f32 1.0, %v2392_v33 }
0x2a3e   :  { %v2409_v36 = vmul.f32 %v2401_v3, %v2241_v35 }
0x2a3f   :  { %v2408_v41 = vmul.f32 %v2400_v56, %v2240_v32 }
0x2a40   :  { %v2417_v40 = vadd.f32 1.0, %v2409_v36 }
0x2a41   :  { %v2416_v46 = vadd.f32 1.0, %v2408_v41 }
0x2a42   :  { %v2425_v47 = vmul.f32 %v2417_v40, %v2217_v34 }
0x2a43   :  { %v2424_v37 = vmul.f32 %v2416_v46, %v2216_v2 }
0x2a45   :  { %3059 = vmatprep.mubr.msk.f32.mxu1 %vm212_vm2, %v2424_v37 }
0x2a46   :  { %3060 = vmatmul.mubr.msk.f32.gmra.mrb[26].mxu1 %vm212_vm2, %v2425_v47 }
0x2a47   :  { %3368 = shalt.err (!%p3365_p4)
}
0x2a48   :  { %s3369_s29 = scalar_lea.hbm %s4128_s14, 256 }
0x2a49   :  { %p3370_p5 = scmp.ne.s32.totalorder %s4128_s14, %s3369_s29  ;;  %p3373_p6 = scmp.lt.u32.totalorder %s3369_s29, %s4128_s14 }
0x2a4b   :  { %p3375_p7 = pnand %p3373_p6, %p3370_p5 }
0x2a4d   :  { %3378 = shalt.err (!%p3375_p7)
}
0x2a4e   :  { %s3413_s18 = smov 128   ;;  %s3414_s3 = smov 8  }
0x2a4f   :  { %2588 = dma.vmem_to_hbm [thread:$0]  %s2583_s7, 256, %s4128_s14, [#allocation5], %s3413_s18, %s3413_s18, %s3414_s3  }
0x2a50   :  { %s3415_s5 = smov [#allocation6]  }
0x2a51   :  { %s2594_s20 = sshll.u32 %s3415_s5, 4  ;;  %s2595_s20 = int_to_ptr.vmem [resolvable:$true] %s2594_s20 }
0x2a52   :  { %s3379_s6 = scalar_lea.vmem %s2595_s20, 256  ;;  %p3384_p9 = scmp.lt.s32.totalorder %s2595_s20, %s2595_s20 }
0x2a53   :  { %p3380_p8 = scmp.ne.s32.totalorder %s2595_s20, %s3379_s6  ;;  %p3385_p10 = scmp.lt.s32.totalorder %s3379_s6, %s3379_s6 }
0x2a55   :  { %p3386_p11 = por %p3385_p10, %p3384_p9 }
0x2a57   :  { %p3387_p12 = pnand %p3386_p11, %p3380_p8 }
0x2a59   :  { %3390 = shalt.err (!%p3387_p12)
}
0x2a5a   :  { %s3391_s12 = scalar_lea.hbm %s4129_s15, 256 }
0x2a5b   :  { %p3392_p13 = scmp.ne.s32.totalorder %s4129_s15, %s3391_s12  ;;  %p3395_p0 = scmp.lt.u32.totalorder %s3391_s12, %s4129_s15 }
0x2a5d   :  { %p3397_p1 = pnand %p3395_p0, %p3392_p13 }
0x2a5f   :  { %3400 = shalt.err (!%p3397_p1)
}
0x2a60   :  { %2600 = dma.vmem_to_hbm [thread:$0]  %s2595_s20, 256, %s4129_s15, [#allocation7], %s3413_s18, %s3413_s18, %s3414_s3  }
0x2b19   :  { %v3061_v26 = vpop.f32.mrb[26].mxu1 }
0x2b1a   :  { %v2563_v9 = vadd.f32 %v3061_v26, %v4031_v8  ;;  %v2557_v48 = vpop.f32.mrb[27].mxu1 }
0x2b1b   :  { %v2558_v12 = vadd.f32 %v4031_v8, %v2557_v48 }
0x2b1c   :  { %2574 = vst.msk [vmem:[%s4127_s13 + $0x38] sm:$0xff] %vm2566_vm9, %v2563_v9 }
0x2b1d   :  { %2573 = vst.msk [vmem:[%s4127_s13 + $0x30] sm:$0xff] %vm2566_vm9, %v2558_v12 }
0x2b1e   :  { %3401 = dma.done.wait [#allocation5], 256  }
0x2b1f   :  { %3402 = vsyncadd [#allocation5], 4294967040 }
0x2b20   :  { %3403 = dma.done.wait [#allocation7], 256  }
0x2b21   :  { %3404 = vsyncadd [#allocation7], 4294967040 }
0x2b22   :  { %2609 = vsyncpa [#allocation5], 1 }
0x2b23   :  { %2610 = vsyncpa [#allocation7], 1 }

</bundles_post_ra>
